<compile_context>
chip_gen: v7x
topology: tpu7x:2x2x1
jax: 0.10.0
libtpu: 0.0.40
codegen_flags: <defaults>
</compile_context>

<pallas_src>
import jax
import jax.numpy as jnp
from jax.experimental import pallas as pl
from jax.experimental.pallas import tpu as pltpu

_LANE = 128
_SUBLANE = 8


# ---------------------------------------------------------------------------
# Padding / spec helpers
# ---------------------------------------------------------------------------
def _round_up(x, m):
    return ((x + m - 1) // m) * m


def _pad2d(a, rows, cols):
    r, c = a.shape
    return jnp.pad(a, ((0, rows - r), (0, cols - c)))


def _const_spec(shape):
    ndim = len(shape)
    return pl.BlockSpec(shape, lambda l, i, k, _n=ndim: (0,) * _n)


def _pick_tile(n):
    """256-wide tiles on v6e/v7x-class MXUs, 128 on v5e; capped for tiny N."""
    pref = 256
    try:
        kind = jax.devices()[0].device_kind.lower()
        if "v5 lite" in kind or "v5e" in kind:
            pref = 128
    except Exception:
        pass
    return min(pref, max(_round_up(n, _LANE), _LANE))


def _vmem_limit_bytes(tile, n_pad, d_pad, g_pad, m_pad, o_pad):
    bf16, f32 = 2, 4
    resident = (
        2 * tile * tile * bf16            # A_hat tile (double-buffered)
        + 2 * tile * d_pad * bf16         # X row tile
        + 2 * g_pad * tile * bf16         # pool one-hot column tile
        + 2 * d_pad * d_pad * bf16        # conv weight block
        + 2 * d_pad * f32                 # conv bias block
        + d_pad * m_pad * bf16 + m_pad * f32
        + m_pad * o_pad * bf16 + o_pad * f32
        + g_pad * o_pad * f32             # output block
        + tile * d_pad * f32              # row-tile accumulator scratch
        + g_pad * d_pad * f32             # pooled-sum accumulator scratch
        + 2 * n_pad * d_pad * bf16        # H ping/pong buffers
    )
    # 2x headroom, clamped to [32 MiB, 64 MiB] (v7x physical VMEM is 64 MiB).
    return int(min(max(2 * resident, 32 << 20), 64 << 20))


# ---------------------------------------------------------------------------
# Fused tiled kernel:
#   grid = (layer, A row tile i, node contraction tile k)   — k fastest
# ---------------------------------------------------------------------------
def _gcn_kernel(a_ref, x_ref, p_ref, rcp_ref, cw_ref, cb_ref,
                w1_ref, b1_ref, w2_ref, b2_ref, o_ref,
                acc_ref, pool_ref, ha_ref, hb_ref):
    l = pl.program_id(0)
    i = pl.program_id(1)
    k = pl.program_id(2)
    n_l = pl.num_programs(0)
    n_i = pl.num_programs(1)
    n_k = pl.num_programs(2)

    tm = a_ref.shape[0]
    tk = a_ref.shape[1]

    # ---- init accumulators -------------------------------------------------
    @pl.when((l == 0) & (i == 0) & (k == 0))
    def _():
        pool_ref[...] = jnp.zeros_like(pool_ref)

    @pl.when(k == 0)
    def _():
        acc_ref[...] = jnp.zeros_like(acc_ref)

    # ---- accumulate A_tile @ (H_ktile @ W_l) over the contraction axis -----
    w = cw_ref[0]                                   # (D, D) bf16, layer-resident

    def accumulate(h_in):                           # h_in: (tk, D) bf16
        xw = jnp.dot(h_in, w, preferred_element_type=jnp.float32)
        acc_ref[...] += jnp.dot(a_ref[...], xw.astype(jnp.bfloat16),
                                preferred_element_type=jnp.float32)

    k_start = pl.multiple_of(k * tk, tk)

    @pl.when(l == 0)                                # layer 0 reads the input X
    def _():
        accumulate(x_ref[...])

    @pl.when((l > 0) & (l % 2 == 1))                # odd layers read ping buffer
    def _():
        accumulate(ha_ref[pl.ds(k_start, tk), :])

    @pl.when((l > 0) & (l % 2 == 0))                # even layers >0 read pong
    def _():
        accumulate(hb_ref[pl.ds(k_start, tk), :])

    # ---- finalize one row-tile of this layer -------------------------------
    @pl.when(k == n_k - 1)
    def _():
        h_out = jnp.maximum(acc_ref[...] + cb_ref[0], 0.0)    # (tm, D) f32
        h_bf = h_out.astype(jnp.bfloat16)
        i_start = pl.multiple_of(i * tm, tm)

        @pl.when(l % 2 == 0)                        # layer l writes buffer l % 2
        def _():
            ha_ref[pl.ds(i_start, tm), :] = h_bf

        @pl.when(l % 2 == 1)
        def _():
            hb_ref[pl.ds(i_start, tm), :] = h_bf

        # Last conv layer: fold this row tile into the mean-pool sum (bf16 0/1
        # one-hot operand, f32 accumulation — exact).
        @pl.when(l == n_l - 1)
        def _():
            pool_ref[...] += jnp.dot(p_ref[...], h_bf,
                                     preferred_element_type=jnp.float32)

        # Very last grid step: mean (f32 reciprocal counts), lin1+relu, lin.
        # dropout(p=0.5, training=False) is the identity in eval mode.
        @pl.when((l == n_l - 1) & (i == n_i - 1))
        def _():
            pooled = pool_ref[...] * rcp_ref[...]              # (G, D) f32
            z = jnp.dot(pooled.astype(jnp.bfloat16), w1_ref[...],
                        preferred_element_type=jnp.float32) + b1_ref[...]
            z = jnp.maximum(z, 0.0)
            y = jnp.dot(z.astype(jnp.bfloat16), w2_ref[...],
                        preferred_element_type=jnp.float32) + b2_ref[...]
            o_ref[...] = y.astype(o_ref.dtype)                 # lane-dense store


# ---------------------------------------------------------------------------
# Plain-JAX glue: graph structure -> dense operators, parameter init
# ---------------------------------------------------------------------------
def normalized_adjacency(edge_index, num_nodes):
    """D^-1/2 (A + I) D^-1/2; duplicate edges accumulate (PyG scatter-add)."""
    src = edge_index[0]
    dst = edge_index[1]
    a = jnp.zeros((num_nodes, num_nodes), jnp.float32).at[dst, src].add(1.0)
    a = a + jnp.eye(num_nodes, dtype=jnp.float32)           # add self loops
    deg = jnp.sum(a, axis=1)
    dinv = jax.lax.rsqrt(jnp.maximum(deg, 1.0))
    return dinv[:, None] * a * dinv[None, :]


def _uniform_init(key, shape, fan_in):
    bound = 1.0 / jnp.sqrt(jnp.asarray(fan_in, jnp.float32))
    return jax.random.uniform(key, shape, jnp.float32, minval=-bound, maxval=bound)


def init_params(key, input_channels, hidden_channels, n_layers):
    params = {"convs": []}
    dims = [input_channels] + [hidden_channels] * n_layers
    for i in range(n_layers):
        key, kw, kb = jax.random.split(key, 3)
        w = _uniform_init(kw, (dims[i], dims[i + 1]), dims[i])
        b = _uniform_init(kb, (dims[i + 1],), dims[i])
        params["convs"].append((w, b))
    key, kw1, kb1, kw2, kb2 = jax.random.split(key, 5)
    params["lin1_w"] = _uniform_init(kw1, (hidden_channels, 32), hidden_channels)
    params["lin1_b"] = _uniform_init(kb1, (32,), hidden_channels)
    params["lin_w"] = _uniform_init(kw2, (32, 2), 32)
    params["lin_b"] = _uniform_init(kb2, (2,), 32)
    return params


# ---------------------------------------------------------------------------
# Forward: pad to lane-dense shapes, run the single fused tiled kernel, slice.
# ---------------------------------------------------------------------------
def gcn_forward(params, x, edge_index, batch, num_graphs):
    n, c_in = x.shape
    n_layers = len(params["convs"])
    hidden = params["convs"][0][0].shape[1]

    tile = _pick_tile(n)
    n_pad = _round_up(n, tile)                     # node dim, multiple of tile
    d_pad = max(_round_up(c_in, _LANE), _round_up(hidden, _LANE))
    m_pad = _round_up(32, _LANE)
    o_pad = _round_up(2, _LANE)
    g_pad = _round_up(num_graphs, _SUBLANE)

    # TODO(synk): for large graphs, build A_hat directly in bf16 / CSR form and
    # replace the dense aggregation with a scalar-prefetch sparse kernel.
    a_hat = normalized_adjacency(edge_index, n)                    # [N, N] f32
    a_p = _pad2d(a_hat, n_pad, n_pad).astype(jnp.bfloat16)
    x_p = _pad2d(x.astype(jnp.float32), n_pad, d_pad).astype(jnp.bfloat16)

    onehot = (batch[None, :] == jnp.arange(num_graphs)[:, None]).astype(jnp.float32)
    counts = jnp.maximum(jnp.sum(onehot, axis=1, keepdims=True), 1.0)   # [G, 1]
    p_p = _pad2d(onehot, g_pad, n_pad).astype(jnp.bfloat16)             # 0/1 exact
    rcp = jnp.pad(1.0 / counts, ((0, g_pad - num_graphs), (0, 0)))      # [Gp,1] f32

    conv_w = jnp.stack([_pad2d(w, d_pad, d_pad) for w, _ in params["convs"]])
    conv_w = conv_w.astype(jnp.bfloat16)                                 # [L, D, D]
    conv_b = jnp.stack(
        [jnp.pad(b, (0, d_pad - b.shape[0])).reshape(1, d_pad)
         for _, b in params["convs"]]).astype(jnp.float32)               # [L, 1, D]

    w1 = _pad2d(params["lin1_w"], d_pad, m_pad).astype(jnp.bfloat16)
    b1 = jnp.pad(params["lin1_b"], (0, m_pad - params["lin1_b"].shape[0])
                 ).reshape(1, m_pad).astype(jnp.float32)
    w2 = _pad2d(params["lin_w"], m_pad, o_pad).astype(jnp.bfloat16)
    b2 = jnp.pad(params["lin_b"], (0, o_pad - params["lin_b"].shape[0])
                 ).reshape(1, o_pad).astype(jnp.float32)

    grid = (n_layers, n_pad // tile, n_pad // tile)

    in_specs = [
        pl.BlockSpec((tile, tile), lambda l, i, k: (i, k)),        # A_hat tile
        pl.BlockSpec((tile, d_pad), lambda l, i, k: (k, 0)),       # X rows (k-tile)
        pl.BlockSpec((g_pad, tile), lambda l, i, k: (0, i)),       # pool cols (i-tile)
        _const_spec((g_pad, 1)),                                   # 1/count (f32)
        pl.BlockSpec((1, d_pad, d_pad), lambda l, i, k: (l, 0, 0)),  # conv W_l
        pl.BlockSpec((1, 1, d_pad), lambda l, i, k: (l, 0, 0)),      # conv b_l
        _const_spec((d_pad, m_pad)),                               # lin1 W
        _const_spec((1, m_pad)),                                   # lin1 b
        _const_spec((m_pad, o_pad)),                               # lin W
        _const_spec((1, o_pad)),                                   # lin b
    ]

    out_padded = pl.pallas_call(
        _gcn_kernel,
        out_shape=jax.ShapeDtypeStruct((g_pad, o_pad), jnp.float32),
        grid=grid,
        in_specs=in_specs,
        out_specs=pl.BlockSpec((g_pad, o_pad), lambda l, i, k: (0, 0)),
        scratch_shapes=[
            pltpu.VMEM((tile, d_pad), jnp.float32),    # row-tile accumulator
            pltpu.VMEM((g_pad, d_pad), jnp.float32),   # pooled-sum accumulator
            pltpu.VMEM((n_pad, d_pad), jnp.bfloat16),  # H ping buffer
            pltpu.VMEM((n_pad, d_pad), jnp.bfloat16),  # H pong buffer
        ],
        compiler_params=pltpu.CompilerParams(
            dimension_semantics=("arbitrary", "arbitrary", "arbitrary"),
            vmem_limit_bytes=_vmem_limit_bytes(tile, n_pad, d_pad, g_pad,
                                               m_pad, o_pad),
        ),
    )(a_p, x_p, p_p, rcp, conv_w, conv_b, w1, b1, w2, b2)

    return out_padded[:num_graphs, :2]


# ---------------------------------------------------------------------------
if __name__ == "__main__":
    INPUT_CHANNELS = 4
    HIDDEN_CHANNELS = 8
    N_LAYERS = 2
    NUM_NODES = 16
    NUM_EDGES = 32
    NUM_GRAPHS = 2

    key = jax.random.PRNGKey(0)
    key, kx, ke_src, ke_dst = jax.random.split(key, 4)

    # Node features [N, C]
    x = jax.random.normal(kx, (NUM_NODES, INPUT_CHANNELS), jnp.float32)

    # Two graphs of 8 nodes each; edges stay inside their graph.
    half = NUM_NODES // 2
    src0 = jax.random.randint(ke_src, (NUM_EDGES // 2,), 0, half)
    dst0 = jax.random.randint(ke_dst, (NUM_EDGES // 2,), 0, half)
    src = jnp.concatenate([src0, src0 + half])
    dst = jnp.concatenate([dst0, dst0 + half])
    edge_index = jnp.stack([src, dst], axis=0).astype(jnp.int32)   # [2, E]

    batch = jnp.concatenate([
        jnp.zeros((half,), jnp.int32),
        jnp.ones((half,), jnp.int32),
    ])                                                             # [N]

    params = init_params(jax.random.PRNGKey(12345), INPUT_CHANNELS,
                         HIDDEN_CHANNELS, N_LAYERS)

    out = gcn_forward(params, x, edge_index, batch, NUM_GRAPHS)
    out = jax.block_until_ready(out)
    assert out.shape == (NUM_GRAPHS, 2)
    print("KERNEL_OK")
</pallas_src>

<mosaic_0001>
module attributes {stable_mosaic.version = 11 : i64} {
  func.func @_gcn_kernel(%arg0: i32, %arg1: i32, %arg2: i32, %arg3: memref<128x128xbf16, #tpu.memory_space<vmem>>, %arg4: memref<128x128xbf16, #tpu.memory_space<vmem>>, %arg5: memref<8x128xbf16, #tpu.memory_space<vmem>>, %arg6: memref<8x1xf32, #tpu.memory_space<vmem>>, %arg7: memref<1x128x128xbf16, #tpu.memory_space<vmem>>, %arg8: memref<1x1x128xf32, #tpu.memory_space<vmem>>, %arg9: memref<128x128xbf16, #tpu.memory_space<vmem>>, %arg10: memref<1x128xf32, #tpu.memory_space<vmem>>, %arg11: memref<128x128xbf16, #tpu.memory_space<vmem>>, %arg12: memref<1x128xf32, #tpu.memory_space<vmem>>, %arg13: memref<8x128xf32, #tpu.memory_space<vmem>>, %arg14: memref<128x128xf32, #tpu.memory_space<vmem>>, %arg15: memref<8x128xf32, #tpu.memory_space<vmem>>, %arg16: memref<128x128xbf16, #tpu.memory_space<vmem>>, %arg17: memref<128x128xbf16, #tpu.memory_space<vmem>>) attributes {dimension_semantics = [#tpu.dimension_semantics<arbitrary>, #tpu.dimension_semantics<arbitrary>, #tpu.dimension_semantics<arbitrary>], iteration_bounds = array<i64: 2, 1, 1>, scalar_prefetch = 0 : i64, scratch_operands = 4 : i64, tpu.core_type = #tpu.core_type<tc>, window_params = [{transform_indices = @transform_0, window_bounds = array<i64: 128, 128>}, {transform_indices = @transform_1, window_bounds = array<i64: 128, 128>}, {transform_indices = @transform_2, window_bounds = array<i64: 8, 128>}, {pipeline_mode = #tpu.pipeline_mode<synchronous>, transform_indices = @transform_3, window_bounds = array<i64: 8, 1>}, {transform_indices = @transform_4, window_bounds = array<i64: 1, 128, 128>}, {transform_indices = @transform_5, window_bounds = array<i64: 1, 1, 128>}, {pipeline_mode = #tpu.pipeline_mode<synchronous>, transform_indices = @transform_6, window_bounds = array<i64: 128, 128>}, {pipeline_mode = #tpu.pipeline_mode<synchronous>, transform_indices = @transform_7, window_bounds = array<i64: 1, 128>}, {pipeline_mode = #tpu.pipeline_mode<synchronous>, transform_indices = @transform_8, window_bounds = array<i64: 128, 128>}, {pipeline_mode = #tpu.pipeline_mode<synchronous>, transform_indices = @transform_9, window_bounds = array<i64: 1, 128>}, {pipeline_mode = #tpu.pipeline_mode<synchronous>, transform_indices = @transform_10, window_bounds = array<i64: 8, 128>}]} {
    %c0_i32 = arith.constant 0 : i32
    %0 = arith.cmpi eq, %arg0, %c0_i32 : i32
    %c0_i32_0 = arith.constant 0 : i32
    %1 = arith.cmpi eq, %arg1, %c0_i32_0 : i32
    %2 = arith.andi %0, %1 : i1
    %c0_i32_1 = arith.constant 0 : i32
    %3 = arith.cmpi eq, %arg2, %c0_i32_1 : i32
    %4 = arith.andi %2, %3 : i1
    %5 = arith.extui %4 : i1 to i32
    %c0_i32_2 = arith.constant 0 : i32
    %6 = arith.cmpi ne, %5, %c0_i32_2 : i32
    scf.if %6 {
      %cst = arith.constant 0.000000e+00 : f32
      %50 = vector.broadcast %cst : f32 to vector<8x128xf32>
      %c0_27 = arith.constant 0 : index
      %c0_28 = arith.constant 0 : index
      %51 = vector.load %arg15[%c0_27, %c0_28] : memref<8x128xf32, #tpu.memory_space<vmem>>, vector<8x128xf32>
      tpu.vector_store %arg15[%c0_27, %c0_28], %50 {strides = array<i32>} : memref<8x128xf32, #tpu.memory_space<vmem>>, vector<8x128xf32>,
    } else {
    }
    %c0_i32_3 = arith.constant 0 : i32
    %7 = arith.cmpi eq, %arg2, %c0_i32_3 : i32
    %8 = arith.extui %7 : i1 to i32
    %c0_i32_4 = arith.constant 0 : i32
    %9 = arith.cmpi ne, %8, %c0_i32_4 : i32
    scf.if %9 {
      %cst = arith.constant 0.000000e+00 : f32
      %50 = vector.broadcast %cst : f32 to vector<128x128xf32>
      %c0_27 = arith.constant 0 : index
      %c0_28 = arith.constant 0 : index
      %51 = vector.load %arg14[%c0_27, %c0_28] : memref<128x128xf32, #tpu.memory_space<vmem>>, vector<128x128xf32>
      tpu.vector_store %arg14[%c0_27, %c0_28], %50 {strides = array<i32>} : memref<128x128xf32, #tpu.memory_space<vmem>>, vector<128x128xf32>,
    } else {
    }
    %c0 = arith.constant 0 : index
    %c0_5 = arith.constant 0 : index
    %c0_6 = arith.constant 0 : index
    %10 = vector.load %arg7[%c0, %c0_5, %c0_6] : memref<1x128x128xbf16, #tpu.memory_space<vmem>>, vector<1x128x128xbf16>
    %11 = vector.shape_cast %10 : vector<1x128x128xbf16> to vector<128x128xbf16>
    %c128_i32 = arith.constant 128 : i32
    %12 = arith.muli %arg2, %c128_i32 : i32
    %13 = tpu.assume_multiple %12, 128 : i32
    %c0_i32_7 = arith.constant 0 : i32
    %14 = arith.cmpi eq, %arg0, %c0_i32_7 : i32
    %15 = arith.extui %14 : i1 to i32
    %c0_i32_8 = arith.constant 0 : i32
    %16 = arith.cmpi ne, %15, %c0_i32_8 : i32
    scf.if %16 {
      %c0_27 = arith.constant 0 : index
      %c0_28 = arith.constant 0 : index
      %50 = vector.load %arg4[%c0_27, %c0_28] : memref<128x128xbf16, #tpu.memory_space<vmem>>, vector<128x128xbf16>
      %cst = arith.constant dense<0.000000e+00> : vector<128x128xf32>
      %51 = tpu.matmul %50, %11, %cst {dimension_numbers = #tpu.dot_dimension_numbers<[1], [0], [0], [1], [0, 0, 1, 1], [], []>} : vector<128x128xbf16>, vector<128x128xbf16>, vector<128x128xf32> -> vector<128x128xf32>
      %c0_29 = arith.constant 0 : index
      %c0_30 = arith.constant 0 : index
      %52 = vector.load %arg14[%c0_29, %c0_30] : memref<128x128xf32, #tpu.memory_space<vmem>>, vector<128x128xf32>
      %c0_31 = arith.constant 0 : index
      %c0_32 = arith.constant 0 : index
      %53 = vector.load %arg3[%c0_31, %c0_32] : memref<128x128xbf16, #tpu.memory_space<vmem>>, vector<128x128xbf16>
      %54 = arith.truncf %51 : vector<128x128xf32> to vector<128x128xbf16>
      %cst_33 = arith.constant dense<0.000000e+00> : vector<128x128xf32>
      %55 = tpu.matmul %53, %54, %cst_33 {dimension_numbers = #tpu.dot_dimension_numbers<[1], [0], [0], [1], [0, 0, 1, 1], [], []>} : vector<128x128xbf16>, vector<128x128xbf16>, vector<128x128xf32> -> vector<128x128xf32>
      %56 = arith.addf %52, %55 : vector<128x128xf32>
      %c0_34 = arith.constant 0 : index
      %c0_35 = arith.constant 0 : index
      %57 = vector.load %arg14[%c0_34, %c0_35] : memref<128x128xf32, #tpu.memory_space<vmem>>, vector<128x128xf32>
      tpu.vector_store %arg14[%c0_34, %c0_35], %56 {strides = array<i32>} : memref<128x128xf32, #tpu.memory_space<vmem>>, vector<128x128xf32>,
    } else {
    }
    %c0_i32_9 = arith.constant 0 : i32
    %17 = arith.cmpi sgt, %arg0, %c0_i32_9 : i32
    %c2_i32 = arith.constant 2 : i32
    %c0_i32_10 = arith.constant 0 : i32
    %18 = arith.cmpi eq, %c2_i32, %c0_i32_10 : i32
    %c1_i32 = arith.constant 1 : i32
    %19 = arith.select %18, %c1_i32, %c2_i32 : i32
    %20 = arith.remsi %arg0, %19 : i32
    %c0_i32_11 = arith.constant 0 : i32
    %21 = arith.cmpi ne, %20, %c0_i32_11 : i32
    %c0_i32_12 = arith.constant 0 : i32
    %22 = arith.cmpi slt, %20, %c0_i32_12 : i32
    %c0_i32_13 = arith.constant 0 : i32
    %23 = arith.cmpi slt, %19, %c0_i32_13 : i32
    %24 = arith.xori %22, %23 : i1
    %25 = arith.andi %24, %21 : i1
    %26 = arith.addi %20, %19 : i32
    %27 = arith.select %25, %26, %20 : i32
    %c1_i32_14 = arith.constant 1 : i32
    %28 = arith.cmpi eq, %27, %c1_i32_14 : i32
    %29 = arith.andi %17, %28 : i1
    %30 = arith.extui %29 : i1 to i32
    %c0_i32_15 = arith.constant 0 : i32
    %31 = arith.cmpi ne, %30, %c0_i32_15 : i32
    scf.if %31 {
      %50 = arith.index_cast %13 : i32 to index
      %c0_27 = arith.constant 0 : index
      %51 = vector.load %arg16[%50, %c0_27] : memref<128x128xbf16, #tpu.memory_space<vmem>>, vector<128x128xbf16>
      %cst = arith.constant dense<0.000000e+00> : vector<128x128xf32>
      %52 = tpu.matmul %51, %11, %cst {dimension_numbers = #tpu.dot_dimension_numbers<[1], [0], [0], [1], [0, 0, 1, 1], [], []>} : vector<128x128xbf16>, vector<128x128xbf16>, vector<128x128xf32> -> vector<128x128xf32>
      %c0_28 = arith.constant 0 : index
      %c0_29 = arith.constant 0 : index
      %53 = vector.load %arg14[%c0_28, %c0_29] : memref<128x128xf32, #tpu.memory_space<vmem>>, vector<128x128xf32>
      %c0_30 = arith.constant 0 : index
      %c0_31 = arith.constant 0 : index
      %54 = vector.load %arg3[%c0_30, %c0_31] : memref<128x128xbf16, #tpu.memory_space<vmem>>, vector<128x128xbf16>
      %55 = arith.truncf %52 : vector<128x128xf32> to vector<128x128xbf16>
      %cst_32 = arith.constant dense<0.000000e+00> : vector<128x128xf32>
      %56 = tpu.matmul %54, %55, %cst_32 {dimension_numbers = #tpu.dot_dimension_numbers<[1], [0], [0], [1], [0, 0, 1, 1], [], []>} : vector<128x128xbf16>, vector<128x128xbf16>, vector<128x128xf32> -> vector<128x128xf32>
      %57 = arith.addf %53, %56 : vector<128x128xf32>
      %c0_33 = arith.constant 0 : index
      %c0_34 = arith.constant 0 : index
      %58 = vector.load %arg14[%c0_33, %c0_34] : memref<128x128xf32, #tpu.memory_space<vmem>>, vector<128x128xf32>
      tpu.vector_store %arg14[%c0_33, %c0_34], %57 {strides = array<i32>} : memref<128x128xf32, #tpu.memory_space<vmem>>, vector<128x128xf32>,
    } else {
    }
    %c0_i32_16 = arith.constant 0 : i32
    %32 = arith.cmpi sgt, %arg0, %c0_i32_16 : i32
    %c2_i32_17 = arith.constant 2 : i32
    %c0_i32_18 = arith.constant 0 : i32
    %33 = arith.cmpi eq, %c2_i32_17, %c0_i32_18 : i32
    %c1_i32_19 = arith.constant 1 : i32
    %34 = arith.select %33, %c1_i32_19, %c2_i32_17 : i32
    %35 = arith.remsi %arg0, %34 : i32
    %c0_i32_20 = arith.constant 0 : i32
    %36 = arith.cmpi ne, %35, %c0_i32_20 : i32
    %c0_i32_21 = arith.constant 0 : i32
    %37 = arith.cmpi slt, %35, %c0_i32_21 : i32
    %c0_i32_22 = arith.constant 0 : i32
    %38 = arith.cmpi slt, %34, %c0_i32_22 : i32
    %39 = arith.xori %37, %38 : i1
    %40 = arith.andi %39, %36 : i1
    %41 = arith.addi %35, %34 : i32
    %42 = arith.select %40, %41, %35 : i32
    %c0_i32_23 = arith.constant 0 : i32
    %43 = arith.cmpi eq, %42, %c0_i32_23 : i32
    %44 = arith.andi %32, %43 : i1
    %45 = arith.extui %44 : i1 to i32
    %c0_i32_24 = arith.constant 0 : i32
    %46 = arith.cmpi ne, %45, %c0_i32_24 : i32
    scf.if %46 {
      %50 = arith.index_cast %13 : i32 to index
      %c0_27 = arith.constant 0 : index
      %51 = vector.load %arg17[%50, %c0_27] : memref<128x128xbf16, #tpu.memory_space<vmem>>, vector<128x128xbf16>
      %cst = arith.constant dense<0.000000e+00> : vector<128x128xf32>
      %52 = tpu.matmul %51, %11, %cst {dimension_numbers = #tpu.dot_dimension_numbers<[1], [0], [0], [1], [0, 0, 1, 1], [], []>} : vector<128x128xbf16>, vector<128x128xbf16>, vector<128x128xf32> -> vector<128x128xf32>
      %c0_28 = arith.constant 0 : index
      %c0_29 = arith.constant 0 : index
      %53 = vector.load %arg14[%c0_28, %c0_29] : memref<128x128xf32, #tpu.memory_space<vmem>>, vector<128x128xf32>
      %c0_30 = arith.constant 0 : index
      %c0_31 = arith.constant 0 : index
      %54 = vector.load %arg3[%c0_30, %c0_31] : memref<128x128xbf16, #tpu.memory_space<vmem>>, vector<128x128xbf16>
      %55 = arith.truncf %52 : vector<128x128xf32> to vector<128x128xbf16>
      %cst_32 = arith.constant dense<0.000000e+00> : vector<128x128xf32>
      %56 = tpu.matmul %54, %55, %cst_32 {dimension_numbers = #tpu.dot_dimension_numbers<[1], [0], [0], [1], [0, 0, 1, 1], [], []>} : vector<128x128xbf16>, vector<128x128xbf16>, vector<128x128xf32> -> vector<128x128xf32>
      %57 = arith.addf %53, %56 : vector<128x128xf32>
      %c0_33 = arith.constant 0 : index
      %c0_34 = arith.constant 0 : index
      %58 = vector.load %arg14[%c0_33, %c0_34] : memref<128x128xf32, #tpu.memory_space<vmem>>, vector<128x128xf32>
      tpu.vector_store %arg14[%c0_33, %c0_34], %57 {strides = array<i32>} : memref<128x128xf32, #tpu.memory_space<vmem>>, vector<128x128xf32>,
    } else {
    }
    %c0_i32_25 = arith.constant 0 : i32
    %47 = arith.cmpi eq, %arg2, %c0_i32_25 : i32
    %48 = arith.extui %47 : i1 to i32
    %c0_i32_26 = arith.constant 0 : i32
    %49 = arith.cmpi ne, %48, %c0_i32_26 : i32
    scf.if %49 {
      %c0_27 = arith.constant 0 : index
      %c0_28 = arith.constant 0 : index
      %50 = vector.load %arg14[%c0_27, %c0_28] : memref<128x128xf32, #tpu.memory_space<vmem>>, vector<128x128xf32>
      %c0_29 = arith.constant 0 : index
      %c0_30 = arith.constant 0 : index
      %c0_31 = arith.constant 0 : index
      %51 = vector.load %arg8[%c0_29, %c0_30, %c0_31] : memref<1x1x128xf32, #tpu.memory_space<vmem>>, vector<1x1x128xf32>
      %52 = vector.shape_cast %51 : vector<1x1x128xf32> to vector<1x128xf32>
      %53 = vector.broadcast %52 : vector<1x128xf32> to vector<128x128xf32>
      %54 = arith.addf %50, %53 : vector<128x128xf32>
      %cst = arith.constant 0.000000e+00 : f32
      %55 = vector.broadcast %cst : f32 to vector<128x128xf32>
      %56 = arith.maximumf %54, %55 : vector<128x128xf32>
      %57 = arith.truncf %56 : vector<128x128xf32> to vector<128x128xbf16>
      %c128_i32_32 = arith.constant 128 : i32
      %58 = arith.muli %arg1, %c128_i32_32 : i32
      %59 = tpu.assume_multiple %58, 128 : i32
      %c2_i32_33 = arith.constant 2 : i32
      %c0_i32_34 = arith.constant 0 : i32
      %60 = arith.cmpi eq, %c2_i32_33, %c0_i32_34 : i32
      %c1_i32_35 = arith.constant 1 : i32
      %61 = arith.select %60, %c1_i32_35, %c2_i32_33 : i32
      %62 = arith.remsi %arg0, %61 : i32
      %c0_i32_36 = arith.constant 0 : i32
      %63 = arith.cmpi ne, %62, %c0_i32_36 : i32
      %c0_i32_37 = arith.constant 0 : i32
      %64 = arith.cmpi slt, %62, %c0_i32_37 : i32
      %c0_i32_38 = arith.constant 0 : i32
      %65 = arith.cmpi slt, %61, %c0_i32_38 : i32
      %66 = arith.xori %64, %65 : i1
      %67 = arith.andi %66, %63 : i1
      %68 = arith.addi %62, %61 : i32
      %69 = arith.select %67, %68, %62 : i32
      %c0_i32_39 = arith.constant 0 : i32
      %70 = arith.cmpi eq, %69, %c0_i32_39 : i32
      %71 = arith.extui %70 : i1 to i32
      %c0_i32_40 = arith.constant 0 : i32
      %72 = arith.cmpi ne, %71, %c0_i32_40 : i32
      scf.if %72 {
        %94 = arith.index_cast %59 : i32 to index
        %c0_54 = arith.constant 0 : index
        %95 = vector.load %arg16[%94, %c0_54] : memref<128x128xbf16, #tpu.memory_space<vmem>>, vector<128x128xbf16>
        tpu.vector_store %arg16[%94, %c0_54], %57 {strides = array<i32>} : memref<128x128xbf16, #tpu.memory_space<vmem>>, vector<128x128xbf16>,
      } else {
      }
      %c2_i32_41 = arith.constant 2 : i32
      %c0_i32_42 = arith.constant 0 : i32
      %73 = arith.cmpi eq, %c2_i32_41, %c0_i32_42 : i32
      %c1_i32_43 = arith.constant 1 : i32
      %74 = arith.select %73, %c1_i32_43, %c2_i32_41 : i32
      %75 = arith.remsi %arg0, %74 : i32
      %c0_i32_44 = arith.constant 0 : i32
      %76 = arith.cmpi ne, %75, %c0_i32_44 : i32
      %c0_i32_45 = arith.constant 0 : i32
      %77 = arith.cmpi slt, %75, %c0_i32_45 : i32
      %c0_i32_46 = arith.constant 0 : i32
      %78 = arith.cmpi slt, %74, %c0_i32_46 : i32
      %79 = arith.xori %77, %78 : i1
      %80 = arith.andi %79, %76 : i1
      %81 = arith.addi %75, %74 : i32
      %82 = arith.select %80, %81, %75 : i32
      %c1_i32_47 = arith.constant 1 : i32
      %83 = arith.cmpi eq, %82, %c1_i32_47 : i32
      %84 = arith.extui %83 : i1 to i32
      %c0_i32_48 = arith.constant 0 : i32
      %85 = arith.cmpi ne, %84, %c0_i32_48 : i32
      scf.if %85 {
        %94 = arith.index_cast %59 : i32 to index
        %c0_54 = arith.constant 0 : index
        %95 = vector.load %arg17[%94, %c0_54] : memref<128x128xbf16, #tpu.memory_space<vmem>>, vector<128x128xbf16>
        tpu.vector_store %arg17[%94, %c0_54], %57 {strides = array<i32>} : memref<128x128xbf16, #tpu.memory_space<vmem>>, vector<128x128xbf16>,
      } else {
      }
      %c1_i32_49 = arith.constant 1 : i32
      %86 = arith.cmpi eq, %arg0, %c1_i32_49 : i32
      %87 = arith.extui %86 : i1 to i32
      %c0_i32_50 = arith.constant 0 : i32
      %88 = arith.cmpi ne, %87, %c0_i32_50 : i32
      scf.if %88 {
        %c0_54 = arith.constant 0 : index
        %c0_55 = arith.constant 0 : index
        %94 = vector.load %arg15[%c0_54, %c0_55] : memref<8x128xf32, #tpu.memory_space<vmem>>, vector<8x128xf32>
        %c0_56 = arith.constant 0 : index
        %c0_57 = arith.constant 0 : index
        %95 = vector.load %arg5[%c0_56, %c0_57] : memref<8x128xbf16, #tpu.memory_space<vmem>>, vector<8x128xbf16>
        %cst_58 = arith.constant dense<0.000000e+00> : vector<8x128xf32>
        %96 = tpu.matmul %95, %57, %cst_58 {dimension_numbers = #tpu.dot_dimension_numbers<[1], [0], [0], [1], [0, 0, 1, 1], [], []>} : vector<8x128xbf16>, vector<128x128xbf16>, vector<8x128xf32> -> vector<8x128xf32>
        %97 = arith.addf %94, %96 : vector<8x128xf32>
        %c0_59 = arith.constant 0 : index
        %c0_60 = arith.constant 0 : index
        %98 = vector.load %arg15[%c0_59, %c0_60] : memref<8x128xf32, #tpu.memory_space<vmem>>, vector<8x128xf32>
        tpu.vector_store %arg15[%c0_59, %c0_60], %97 {strides = array<i32>} : memref<8x128xf32, #tpu.memory_space<vmem>>, vector<8x128xf32>,
      } else {
      }
      %c1_i32_51 = arith.constant 1 : i32
      %89 = arith.cmpi eq, %arg0, %c1_i32_51 : i32
      %c0_i32_52 = arith.constant 0 : i32
      %90 = arith.cmpi eq, %arg1, %c0_i32_52 : i32
      %91 = arith.andi %89, %90 : i1
      %92 = arith.extui %91 : i1 to i32
      %c0_i32_53 = arith.constant 0 : i32
      %93 = arith.cmpi ne, %92, %c0_i32_53 : i32
      scf.if %93 {
        %c0_54 = arith.constant 0 : index
        %c0_55 = arith.constant 0 : index
        %94 = vector.load %arg15[%c0_54, %c0_55] : memref<8x128xf32, #tpu.memory_space<vmem>>, vector<8x128xf32>
        %c0_56 = arith.constant 0 : index
        %c0_57 = arith.constant 0 : index
        %95 = vector.load %arg6[%c0_56, %c0_57] : memref<8x1xf32, #tpu.memory_space<vmem>>, vector<8x1xf32>
        %96 = vector.broadcast %95 : vector<8x1xf32> to vector<8x128xf32>
        %97 = arith.mulf %94, %96 : vector<8x128xf32>
        %98 = arith.truncf %97 : vector<8x128xf32> to vector<8x128xbf16>
        %c0_58 = arith.constant 0 : index
        %c0_59 = arith.constant 0 : index
        %99 = vector.load %arg9[%c0_58, %c0_59] : memref<128x128xbf16, #tpu.memory_space<vmem>>, vector<128x128xbf16>
        %cst_60 = arith.constant dense<0.000000e+00> : vector<8x128xf32>
        %100 = tpu.matmul %98, %99, %cst_60 {dimension_numbers = #tpu.dot_dimension_numbers<[1], [0], [0], [1], [0, 0, 1, 1], [], []>} : vector<8x128xbf16>, vector<128x128xbf16>, vector<8x128xf32> -> vector<8x128xf32>
        %c0_61 = arith.constant 0 : index
        %c0_62 = arith.constant 0 : index
        %101 = vector.load %arg10[%c0_61, %c0_62] : memref<1x128xf32, #tpu.memory_space<vmem>>, vector<1x128xf32>
        %102 = vector.broadcast %101 : vector<1x128xf32> to vector<8x128xf32>
        %103 = arith.addf %100, %102 : vector<8x128xf32>
        %cst_63 = arith.constant 0.000000e+00 : f32
        %104 = vector.broadcast %cst_63 : f32 to vector<8x128xf32>
        %105 = arith.maximumf %103, %104 : vector<8x128xf32>
        %106 = arith.truncf %105 : vector<8x128xf32> to vector<8x128xbf16>
        %c0_64 = arith.constant 0 : index
        %c0_65 = arith.constant 0 : index
        %107 = vector.load %arg11[%c0_64, %c0_65] : memref<128x128xbf16, #tpu.memory_space<vmem>>, vector<128x128xbf16>
        %cst_66 = arith.constant dense<0.000000e+00> : vector<8x128xf32>
        %108 = tpu.matmul %106, %107, %cst_66 {dimension_numbers = #tpu.dot_dimension_numbers<[1], [0], [0], [1], [0, 0, 1, 1], [], []>} : vector<8x128xbf16>, vector<128x128xbf16>, vector<8x128xf32> -> vector<8x128xf32>
        %c0_67 = arith.constant 0 : index
        %c0_68 = arith.constant 0 : index
        %109 = vector.load %arg12[%c0_67, %c0_68] : memref<1x128xf32, #tpu.memory_space<vmem>>, vector<1x128xf32>
        %110 = vector.broadcast %109 : vector<1x128xf32> to vector<8x128xf32>
        %111 = arith.addf %108, %110 : vector<8x128xf32>
        %c0_69 = arith.constant 0 : index
        %c0_70 = arith.constant 0 : index
        %112 = vector.load %arg13[%c0_69, %c0_70] : memref<8x128xf32, #tpu.memory_space<vmem>>, vector<8x128xf32>
        tpu.vector_store %arg13[%c0_69, %c0_70], %111 {strides = array<i32>} : memref<8x128xf32, #tpu.memory_space<vmem>>, vector<8x128xf32>,
      } else {
      }
    } else {
    }
    return
  }
  func.func @transform_0(%arg0: i32, %arg1: i32, %arg2: i32) -> (i32, i32) {
    %c0_i32 = arith.constant 0 : i32
    return %arg1, %arg2 : i32, i32
  }
  func.func @transform_1(%arg0: i32, %arg1: i32, %arg2: i32) -> (i32, i32) {
    %c0_i32 = arith.constant 0 : i32
    %c0_i32_0 = arith.constant 0 : i32
    return %arg2, %c0_i32 : i32, i32
  }
  func.func @transform_2(%arg0: i32, %arg1: i32, %arg2: i32) -> (i32, i32) {
    %c0_i32 = arith.constant 0 : i32
    %c0_i32_0 = arith.constant 0 : i32
    return %c0_i32, %arg1 : i32, i32
  }
  func.func @transform_3(%arg0: i32, %arg1: i32, %arg2: i32) -> (i32, i32) {
    %c0_i32 = arith.constant 0 : i32
    %c0_i32_0 = arith.constant 0 : i32
    %c0_i32_1 = arith.constant 0 : i32
    return %c0_i32, %c0_i32_0 : i32, i32
  }
  func.func @transform_4(%arg0: i32, %arg1: i32, %arg2: i32) -> (i32, i32, i32) {
    %c0_i32 = arith.constant 0 : i32
    %c0_i32_0 = arith.constant 0 : i32
    %c0_i32_1 = arith.constant 0 : i32
    return %arg0, %c0_i32, %c0_i32_0 : i32, i32, i32
  }
  func.func @transform_5(%arg0: i32, %arg1: i32, %arg2: i32) -> (i32, i32, i32) {
    %c0_i32 = arith.constant 0 : i32
    %c0_i32_0 = arith.constant 0 : i32
    %c0_i32_1 = arith.constant 0 : i32
    return %arg0, %c0_i32, %c0_i32_0 : i32, i32, i32
  }
  func.func @transform_6(%arg0: i32, %arg1: i32, %arg2: i32) -> (i32, i32) {
    %c0_i32 = arith.constant 0 : i32
    %c0_i32_0 = arith.constant 0 : i32
    %c0_i32_1 = arith.constant 0 : i32
    return %c0_i32, %c0_i32_0 : i32, i32
  }
  func.func @transform_7(%arg0: i32, %arg1: i32, %arg2: i32) -> (i32, i32) {
    %c0_i32 = arith.constant 0 : i32
    %c0_i32_0 = arith.constant 0 : i32
    %c0_i32_1 = arith.constant 0 : i32
    return %c0_i32, %c0_i32_0 : i32, i32
  }
  func.func @transform_8(%arg0: i32, %arg1: i32, %arg2: i32) -> (i32, i32) {
    %c0_i32 = arith.constant 0 : i32
    %c0_i32_0 = arith.constant 0 : i32
    %c0_i32_1 = arith.constant 0 : i32
    return %c0_i32, %c0_i32_0 : i32, i32
  }
  func.func @transform_9(%arg0: i32, %arg1: i32, %arg2: i32) -> (i32, i32) {
    %c0_i32 = arith.constant 0 : i32
    %c0_i32_0 = arith.constant 0 : i32
    %c0_i32_1 = arith.constant 0 : i32
    return %c0_i32, %c0_i32_0 : i32, i32
  }
  func.func @transform_10(%arg0: i32, %arg1: i32, %arg2: i32) -> (i32, i32) {
    %c0_i32 = arith.constant 0 : i32
    %c0_i32_0 = arith.constant 0 : i32
    %c0_i32_1 = arith.constant 0 : i32
    return %c0_i32, %c0_i32_0 : i32, i32
  }
}

</mosaic_0001>

<bundles_post_ra>
// kernel: tpu_custom_call.1
= control target key start
LH: loop header
LB: loop body
LE: loop exit
PB: predicated region body
PF: predicated region fallthrough
CT: control target
= control target key end

     0   :  { %s3652_s0 = inlined_call_operand.hbm [shape: bf16[128,128], index: 0, kind: input, shape index: {}]   ;;  %s3653_s1 = inlined_call_operand.hbm [shape: bf16[128,128], index: 1, kind: input, shape index: {}]   ;;  %s3654_s2 = inlined_call_operand.vmem [shape: bf16[8,128], index: 2, kind: input, shape index: {}]   ;;  %s3655_s3 = inlined_call_operand.vmem [shape: f32[8,1], index: 3, kind: input, shape index: {}]   ;;  %s3656_s4 = inlined_call_operand.hbm [shape: bf16[2,128,128], index: 4, kind: input, shape index: {}]   ;;  %s3657_s5 = inlined_call_operand.vmem [shape: f32[2,1,128], index: 5, kind: input, shape index: {}]   ;;  %s3658_s6 = inlined_call_operand.hbm [shape: bf16[128,128], index: 6, kind: input, shape index: {}]   ;;  %s3659_s7 = inlined_call_operand.vmem [shape: f32[1,128], index: 7, kind: input, shape index: {}]   ;;  %s3660_s8 = inlined_call_operand.hbm [shape: bf16[128,128], index: 8, kind: input, shape index: {}]   ;;  %s3661_s9 = inlined_call_operand.vmem [shape: f32[1,128], index: 9, kind: input, shape index: {}]   ;;  %s3662_s10 = inlined_call_operand.hbm [shape: f32[8,128], index: 10, kind: output, shape index: {}]  }
   0x1   :  { %3667 = sst [smem:[#allocation22_spill]] %s3655_s3 }
   0x2   :  { %3668 = sst [smem:[#allocation23_spill]] %s3659_s7 }
   0x3   :  { %3669 = sst [smem:[#allocation24_spill]] %s3661_s9 }
   0x4   :  { %3670 = sst [smem:[#allocation25_spill]] %s3662_s10 }
   0x5   :  { %15 = vsyncpa [#allocation7], 0 }
   0x6   :  { %16 = vsyncpa [#allocation10], 0 }
   0x7   :  { %17 = vsyncpa [#allocation14], 0 }
   0x8   :  { %18 = vsyncpa [#allocation8], 0  ;;  %s3224_s13 = smov 0   ;;  %s3226_s14 = smov 0  }
   0x9   :  { %s3228_s15 = smov 0   ;;  %s3230_s16 = smov 0  }
   0xa   :  { %s3232_s17 = smov 0   ;;  %s3234_s18 = smov 0  }
   0xb LB: > { %s3253_s19 = sadd.s32 4294967295, %s3152_s18   ;;  %p164_p0 = scmp.ne.s32.totalorder %s3136_s14, %s3132_s13  ;;  %s3152_s18 = sphi %s3234_s18, %s24_s18   ;;  %s3148_s17 = sphi %s3232_s17, %s3695_s17   ;;  %s3144_s16 = sphi %s3230_s16, %s3694_s16   ;;  %s3140_s15 = sphi %s3228_s15, %s3693_s15   ;;  %s3136_s14 = sphi %s3226_s14, %s3692_s14   ;;  %s3132_s13 = sphi %s3224_s13, %s3691_s13  }
   0xc   : > { %p3663_p1 = scmp.eq.s32.totalorder %s3253_s19, 0  ;;  %p2269_p2 = scmp.ge.s32.totalorder %s3152_s18, 1 }
   0xd   : > { %p306_p3 = scmp.lt.s32.totalorder %s3152_s18, 3  ;;  %s3154_s22 = smov [#allocation6]  }
   0xe   : > { %p3261_p4 = por %p3663_p1, %p164_p0  ;;  %s322_s23 = sshll.u32 %s3154_s22, 4  ;;  %s3269_s23 = int_to_ptr.vmem [resolvable:$true] %s322_s23 }
   0xf   : > { %p3265_p5 = pnand %p2269_p2, %p306_p3  ;;  %s3155_s25 = smov [#allocation9]  }
  0x10   : > { %s3671_s20 = scalar_select %p3261_p4, 1, 0 }
  0x11   : > { %s3672_s21 = scalar_select %p3265_p5, 1, 0 }
  0x12   : > { %p2775_p6 = pneg %p3265_p5  ;;  %s338_s26 = sshll.u32 %s3155_s25, 4  ;;  %s3279_s26 = int_to_ptr.vmem [resolvable:$true] %s338_s26 }
  0x13   : > { %s3156_s27 = smov [#allocation12]   ;;  %s2914_s11 = scalar_lea.hbm %s3652_s0, 1024 }
  0x14   : > { %p3275_p7 = pnand %p2775_p6, %p3663_p1  ;;  %s3281_s28 = sshll.u32 %s3156_s27, 4  ;;  %s362_s28 = int_to_ptr.vmem [resolvable:$true] %s3281_s28 }
  0x15   : > { %p2915_p8 = scmp.ne.s32.totalorder %s3652_s0, %s2914_s11  ;;  %p2921_p12 = scmp.lt.u32.totalorder %s2914_s11, %s3652_s0 }
  0x16   : > { %p3291_p9 = pneg %p3275_p7 }
  0x18   : > { %p2917_p10 = pnand %p3291_p9, %p2915_p8 }
  0x1a   : > { %p2918_p11 = pneg %p2917_p10 }
  0x1c   : > { %p2923_p13 = pnand %p2921_p12, %p2918_p11 }
  0x1e   : > { %2926 = shalt.err (!%p2923_p13)
}
  0x1f   : > { %s2927_s29 = scalar_lea.vmem %s3269_s23, 1024  ;;  %p2935_p6 = scmp.lt.s32.totalorder %s3269_s23, %s3269_s23 }
  0x20   : > { %p2928_p0 = scmp.ne.s32.totalorder %s3269_s23, %s2927_s29  ;;  %p2936_p1 = scmp.lt.s32.totalorder %s2927_s29, %s2927_s29 }
  0x22   : > { %p2930_p2 = pnand %p2928_p0, %p3291_p9  ;;  %p2937_p8 = por %p2936_p1, %p2935_p6 }
  0x24   : > { %p2931_p3 = pneg %p2930_p2 }
  0x26   : > { %p2938_p10 = pnand %p2937_p8, %p2931_p3 }
  0x28   : > { %2941 = shalt.err (!%p2938_p10)
}
  0x29   : > { %s3157_s30 = smov 64   ;;  %s3158_s11 = smov 4  }
  0x2a   : > { %2778 = dma.hbm_to_vmem [thread:$0]  (!%p3275_p7), %s3652_s0, 1024, %s3269_s23, [#allocation7], %s3157_s30, %s3157_s30, %s3158_s11  }
  0x2b   : > { %s2942_s29 = scalar_lea.hbm %s3653_s1, 1024 }
  0x2c   : > { %p2943_p1 = scmp.ne.s32.totalorder %s3653_s1, %s2942_s29  ;;  %p2949_p13 = scmp.lt.u32.totalorder %s2942_s29, %s3653_s1 }
  0x2e   : > { %p2945_p11 = pnand %p2943_p1, %p3291_p9 }
  0x30   : > { %p2946_p12 = pneg %p2945_p11 }
  0x32   : > { %p2951_p0 = pnand %p2949_p13, %p2946_p12 }
  0x34   : > { %2954 = shalt.err (!%p2951_p0)
}
  0x35   : > { %s2955_s23 = scalar_lea.vmem %s3279_s26, 1024  ;;  %p2963_p8 = scmp.lt.s32.totalorder %s3279_s26, %s3279_s26 }
  0x36   : > { %p2956_p2 = scmp.ne.s32.totalorder %s3279_s26, %s2955_s23  ;;  %p2964_p10 = scmp.lt.s32.totalorder %s2955_s23, %s2955_s23 }
  0x38   : > { %p2958_p3 = pnand %p2956_p2, %p3291_p9  ;;  %p2965_p1 = por %p2964_p10, %p2963_p8 }
  0x3a   : > { %p2959_p6 = pneg %p2958_p3 }
  0x3c   : > { %p2966_p11 = pnand %p2965_p1, %p2959_p6 }
  0x3e   : > { %2969 = shalt.err (!%p2966_p11)
}
  0x3f   : > { %2781 = dma.hbm_to_vmem [thread:$0]  (!%p3275_p7), %s3653_s1, 1024, %s3279_s26, [#allocation10], %s3157_s30, %s3157_s30, %s3158_s11  }
  0x40   : > { %s2970_s12 = scalar_lea.hbm %s3658_s6, 1024 }
  0x41   : > { %p2971_p12 = scmp.ne.s32.totalorder %s3658_s6, %s2970_s12  ;;  %p2977_p2 = scmp.lt.u32.totalorder %s2970_s12, %s3658_s6 }
  0x43   : > { %p2973_p13 = pnand %p2971_p12, %p3291_p9 }
  0x45   : > { %p2974_p0 = pneg %p2973_p13 }
  0x47   : > { %p2979_p3 = pnand %p2977_p2, %p2974_p0 }
  0x49   : > { %2982 = shalt.err (!%p2979_p3)
}
  0x4a   : > { %s2983_s23 = scalar_lea.vmem %s362_s28, 1024  ;;  %p2991_p1 = scmp.lt.s32.totalorder %s362_s28, %s362_s28 }
  0x4b   : > { %p2984_p6 = scmp.ne.s32.totalorder %s362_s28, %s2983_s23  ;;  %p2992_p11 = scmp.lt.s32.totalorder %s2983_s23, %s2983_s23 }
  0x4d   : > { %p2986_p8 = pnand %p2984_p6, %p3291_p9  ;;  %p2993_p4 = por %p2992_p11, %p2991_p1 }
  0x4f   : > { %p2987_p10 = pneg %p2986_p8 }
  0x51   : > { %p2994_p5 = pnand %p2993_p4, %p2987_p10 }
  0x53   : > { %2997 = shalt.err (!%p2994_p5)
}
  0x54   : > { %2784 = dma.hbm_to_vmem [thread:$0]  (!%p3275_p7), %s3658_s6, 1024, %s362_s28, [#allocation10], %s3157_s30, %s3157_s30, %s3158_s11  }
  0x55   : > { %s3159_s7 = smov [#allocation13]   ;;  %s2998_s13 = scalar_lea.hbm %s3660_s8, 1024 }
  0x56   : > { %s377_s9 = sshll.u32 %s3159_s7, 4  ;;  %p2999_p4 = scmp.ne.s32.totalorder %s3660_s8, %s2998_s13  ;;  %s378_s9 = int_to_ptr.vmem [resolvable:$true] %s377_s9 }
  0x57   : > { %p3005_p13 = scmp.lt.u32.totalorder %s2998_s13, %s3660_s8 }
  0x58   : > { %p3001_p5 = pnand %p2999_p4, %p3291_p9 }
  0x5a   : > { %p3002_p12 = pneg %p3001_p5 }
  0x5c   : > { %p3007_p0 = pnand %p3005_p13, %p3002_p12 }
  0x5e   : > { %3010 = shalt.err (!%p3007_p0)
}
  0x5f   : > { %s3011_s28 = scalar_lea.vmem %s378_s9, 1024  ;;  %p3019_p8 = scmp.lt.s32.totalorder %s378_s9, %s378_s9 }
  0x60   : > { %p3012_p2 = scmp.ne.s32.totalorder %s378_s9, %s3011_s28  ;;  %p3020_p10 = scmp.lt.s32.totalorder %s3011_s28, %s3011_s28 }
  0x62   : > { %p3014_p3 = pnand %p3012_p2, %p3291_p9  ;;  %p3021_p1 = por %p3020_p10, %p3019_p8 }
  0x64   : > { %p3015_p6 = pneg %p3014_p3 }
  0x66   : > { %p3022_p11 = pnand %p3021_p1, %p3015_p6 }
  0x68   : > { %3025 = shalt.err (!%p3022_p11)
}
  0x69   : > { %2787 = dma.hbm_to_vmem [thread:$0]  (!%p3275_p7), %s3660_s8, 1024, %s378_s9, [#allocation14], %s3157_s30, %s3157_s30, %s3158_s11  }
  0x6a   : > { %s43_s22 = sadd.s32 1, %s3148_s17  ;;  %s151_s24 = sadd.s32 1, %s3140_s15 }
  0x6b   : > { %p45_p9 = scmp.ge.s32.totalorder %s43_s22, 2  ;;  %p158_p4 = scmp.ne.s32.totalorder %s3140_s15, %s3136_s14 }
  0x6c   : > { %p159_p5 = scmp.eq.s32.totalorder %s3152_s18, 0  ;;  %p2796_p12 = scmp.lt.s32.totalorder %s3152_s18, 2 }
  0x6d   : > { %s3697_s22 = smov (%p45_p9, %s43_s22), 0  ;;  %s394_s7 = sand.u32 1, %s3152_s18  }
  0x6e   : > { %p160_p13 = por %p159_p5, %p158_p4  ;;  %s148_s10 = ssub.s32 %s3148_s17, %s3697_s22 }
  0x6f   : > { %p149_p0 = scmp.eq.s32.totalorder %s148_s10, 0  ;;  %s396_s12 = sand.u32 1, %s3140_s15  }
  0x70   : > { %s2276_s13 = sshll.u32 %s396_s12, 6  ;;  %s2374_s25 = sshll.u32 %s3148_s17, 10 }
  0x71   : > { %s3398_s27 = scalar_select %p149_p0, %s3140_s15, %s151_s24  }
  0x72   : > { %s3403_s23 = scalar_lea.hbm %s3656_s4, %s2374_s25  ;;  %s398_s28 = scalar_lea.vmem [#allocation11], %s2276_s13 }
  0x73   : > { %s405_s26 = sshll.u32 %s398_s28, 4  ;;  %p3407_p7 = pnand %p2796_p12, %p160_p13  ;;  %s3411_s26 = int_to_ptr.vmem [resolvable:$true] %s405_s26 }
  0x74   : > { %s3413_s24 = scalar_lea.sflag [#allocation7], %s394_s7  ;;  %s3026_s10 = scalar_lea.hbm %s3403_s23, 1024 }
  0x75   : > { %p3027_p2 = scmp.ne.s32.totalorder %s3403_s23, %s3026_s10  ;;  %p3028_p3 = pneg %p3407_p7 }
  0x76   : > { %s3031_s25 = scalar_lea.hbm %s3656_s4, 2048  ;;  %p3032_p10 = scmp.lt.u32.totalorder %s3403_s23, %s3656_s4 }
  0x77   : > { %p3029_p6 = pnand %p3028_p3, %p3027_p2  ;;  %p3033_p1 = scmp.lt.u32.totalorder %s3031_s25, %s3026_s10 }
  0x78   : > { %p3035_p9 = scmp.lt.u32.totalorder %s3026_s10, %s3403_s23 }
  0x79   : > { %p3030_p8 = pneg %p3029_p6  ;;  %p3034_p11 = por %p3033_p1, %p3032_p10 }
  0x7b   : > { %p3036_p4 = por %p3035_p9, %p3034_p11 }
  0x7d   : > { %p3037_p5 = pnand %p3036_p4, %p3030_p8 }
  0x7f   : > { %3040 = shalt.err (!%p3037_p5)
}
  0x80   : > { %s3041_s7 = scalar_lea.vmem %s3411_s26, 1024  ;;  %s3160_s28 = smov [#allocation11]  }
  0x81   : > { %p3042_p12 = scmp.ne.s32.totalorder %s3411_s26, %s3041_s7  ;;  %s3046_s12 = sshll.u32 %s3160_s28, 4  ;;  %s3047_s12 = int_to_ptr.vmem [resolvable:$false] %s3046_s12 }
  0x82   : > { %s3048_s13 = scalar_lea.vmem %s3047_s12, 2048  ;;  %p3049_p2 = scmp.lt.s32.totalorder %s3411_s26, %s3047_s12 }
  0x83   : > { %p3044_p13 = pnand %p3042_p12, %p3028_p3  ;;  %p3050_p6 = scmp.lt.s32.totalorder %s3048_s13, %s3041_s7 }
  0x85   : > { %p3045_p0 = pneg %p3044_p13  ;;  %p3051_p10 = por %p3050_p6, %p3049_p2 }
  0x87   : > { %p3052_p1 = pnand %p3051_p10, %p3045_p0 }
  0x89   : > { %3055 = shalt.err (!%p3052_p1)
}
  0x8a   : > { %2791 = dma.hbm_to_vmem [thread:$0]  (!%p3407_p7), %s3403_s23, 1024, %s3411_s26, %s3413_s24, %s3157_s30, %s3157_s30, %s3158_s11  }
  0x8b   : > { %p3676_p3 = scmp.ne.s32.totalorder %s3672_s21, 0 }
  0x8c   : > { %p3677_p8 = scmp.eq.s32.totalorder (!%p3676_p3), %s3253_s19, 0 }
  0x8d   : > { %423 = sbr.rel (%p3676_p3) target bundleno = 2644 (0xa54), region = 60 }
  0x94   : > { %3107 = dma.done.wait (%p3677_p8), [#allocation7], 1024   ;;  %p3678_p11 = pmov %p3677_p8 }
  0x95   : > { %p3679_p9 = pmov %p3677_p8 }
  0x96   : > { %3109 = vsyncadd (%p3678_p11), [#allocation7], 4294966272 }
  0x97   : > { %3111 = dma.done.wait (%p3679_p9), [#allocation10], 1024   ;;  %p3680_p4 = pmov %p3677_p8 }
  0x98   : > { %s433_s3 = sand.u32 1, %s3253_s19   ;;  %s435_s30 = sand.u32 1, %s3136_s14  }
  0x99   : > { %3113 = vsyncadd (%p3680_p4), [#allocation10], 4294966272  ;;  %s2282_s11 = sshll.u32 %s435_s30, 6  ;;  %s434_s21 = scalar_lea.sflag [#allocation7], %s433_s3 }
  0x9a   : > { %s3456_s23 = scalar_lea.vmem [#allocation11], %s2282_s11  ;;  %p3681_p7 = scmp.ne.s32.totalorder %s3671_s20, 0 }
  0x9c   : > { %3115 = dma.done.wait (%p3681_p7), %s434_s21, 1024  }
  0x9d   : > { %3117 = vsyncadd (%p3681_p7), %s434_s21, 4294966272  ;;  %p3682_p5 = pmov %p3680_p4 }
  0x9e   : > { %p3683_p12 = pmov %p3680_p4 }
  0x9f   : > { %3119 = dma.done.wait (%p3682_p5), [#allocation10], 1024  }
  0xa0   : > { %3121 = vsyncadd (%p3683_p12), [#allocation10], 4294966272  ;;  %p3684_p13 = pmov %p3680_p4 }
  0xa1   : > { %p3685_p0 = pmov %p3680_p4 }
  0xa2   : > { %3123 = dma.done.wait (%p3684_p13), [#allocation14], 1024  }
  0xa3   : > { %3125 = vsyncadd (%p3685_p0), [#allocation14], 4294966272  ;;  %p490_p2 = scmp.lt.s32.totalorder %s3144_s16, 1  ;;  %p494_p6 = scmp.eq.s32.totalorder %s3144_s16, 0 }
  0xa4   : > { %v3161_v0 = vmov (%p494_p6), 0.0  }
  0xa5   : > { %s3473_s26 = scalar_select %p490_p2, %s3144_s16, 1 }
  0xa6   : > { %502 = sbr.rel (!%p494_p6) target bundleno = 173 (0xad), region = 84  ;;  %503 = vst [vmem:[#allocation3] sm:$0xff] (%p494_p6), %v3161_v0 }
  0xa7   : > { %s492_s10 = scalar_lea.vmem %s3657_s5, %s3473_s26 }
  0xad PF: > { %v3480_v1 = vld [vmem:[%s3456_s23] sm:$0xf]  ;;  %v3483_v2 = vld [vmem:[%s3456_s23 + $0x4] sm:$0xf]  ;;  %v3162_v3 = vmov 0.0   ;;  %p2287_p10 = scmp.ne.s32.totalorder %s3144_s16, 0 }
  0xae   : > { %507 = vst [vmem:[#allocation2] sm:$0xff] %v3162_v3  ;;  %508 = vst [vmem:[#allocation2 + $0x8] sm:$0xff] %v3162_v3  ;;  %v3486_v4 = vld [vmem:[%s3456_s23 + $0x8] sm:$0xf]  ;;  %v3489_v5 = vld [vmem:[%s3456_s23 + $0xc] sm:$0xf]  ;;  %v2296_v18 = vcombine.low (!%p2287_p10), %v3480_v1, %v3483_v2 }
  0xaf   : > { %509 = vst [vmem:[#allocation2 + $0x10] sm:$0xff] %v3162_v3  ;;  %510 = vst [vmem:[#allocation2 + $0x18] sm:$0xff] %v3162_v3  ;;  %v3492_v6 = vld [vmem:[%s3456_s23 + $0x10] sm:$0xf]  ;;  %v3495_v7 = vld [vmem:[%s3456_s23 + $0x14] sm:$0xf]  ;;  %v2297_v19 = vcombine.low (!%p2287_p10), %v3486_v4, %v3489_v5 }
  0xb0   : > { %511 = vst [vmem:[#allocation2 + $0x20] sm:$0xff] %v3162_v3  ;;  %512 = vst [vmem:[#allocation2 + $0x28] sm:$0xff] %v3162_v3  ;;  %v3498_v8 = vld [vmem:[%s3456_s23 + $0x18] sm:$0xf]  ;;  %v3501_v9 = vld [vmem:[%s3456_s23 + $0x1c] sm:$0xf]  ;;  %2501 = vmatprep.subr.bf16.mxu0 (!%p2287_p10), %v2296_v18  ;;  %v2298_v21 = vcombine.low (!%p2287_p10), %v3492_v6, %v3495_v7 }
  0xb1   : > { %513 = vst [vmem:[#allocation2 + $0x30] sm:$0xff] %v3162_v3  ;;  %514 = vst [vmem:[#allocation2 + $0x38] sm:$0xff] %v3162_v3  ;;  %v3504_v10 = vld [vmem:[%s3456_s23 + $0x20] sm:$0xf]  ;;  %v3507_v11 = vld [vmem:[%s3456_s23 + $0x24] sm:$0xf]  ;;  %2502 = vmatpush3.bf16.msra.mxu0 (!%p2287_p10), %v2296_v18  ;;  %v2299_v22 = vcombine.low (!%p2287_p10), %v3498_v8, %v3501_v9 }
  0xb2   : > { %515 = vst [vmem:[#allocation2 + $0x40] sm:$0xff] %v3162_v3  ;;  %516 = vst [vmem:[#allocation2 + $0x48] sm:$0xff] %v3162_v3  ;;  %v3510_v12 = vld [vmem:[%s3456_s23 + $0x28] sm:$0xf]  ;;  %v3513_v13 = vld [vmem:[%s3456_s23 + $0x2c] sm:$0xf]  ;;  %2503 = vmatprep.subr.bf16.mxu0 (!%p2287_p10), %v2297_v19  ;;  %v2300_v23 = vcombine.low (!%p2287_p10), %v3504_v10, %v3507_v11 }
  0xb3   : > { %517 = vst [vmem:[#allocation2 + $0x50] sm:$0xff] %v3162_v3  ;;  %518 = vst [vmem:[#allocation2 + $0x58] sm:$0xff] %v3162_v3  ;;  %v3516_v14 = vld [vmem:[%s3456_s23 + $0x30] sm:$0xf]  ;;  %v3519_v15 = vld [vmem:[%s3456_s23 + $0x34] sm:$0xf]  ;;  %v2301_v24 = vcombine.low (!%p2287_p10), %v3510_v12, %v3513_v13 }
  0xb4   : > { %519 = vst [vmem:[#allocation2 + $0x60] sm:$0xff] %v3162_v3  ;;  %520 = vst [vmem:[#allocation2 + $0x68] sm:$0xff] %v3162_v3  ;;  %v3522_v16 = vld [vmem:[%s3456_s23 + $0x38] sm:$0xf]  ;;  %v3525_v17 = vld [vmem:[%s3456_s23 + $0x3c] sm:$0xf]  ;;  %v2302_v25 = vcombine.low (!%p2287_p10), %v3516_v14, %v3519_v15 }
  0xb5   : > { %521 = vst [vmem:[#allocation2 + $0x70] sm:$0xff] %v3162_v3  ;;  %522 = vst [vmem:[#allocation2 + $0x78] sm:$0xff] %v3162_v3  ;;  %542 = sbr.rel (%p2287_p10) target bundleno = 699 (0x2bb), region = 92  ;;  %v2865_v20 = vld [vmem:[#allocation9] sm:$0xff] (!%p2287_p10)   ;;  %2504 = vmatpush3.bf16.msra.mxu0 (!%p2287_p10), %v2297_v19  ;;  %v2303_v26 = vcombine.low (!%p2287_p10), %v3522_v16, %v3525_v17  ;;  %v2866_v27 = vld [vmem:[#allocation9 + $0x8] sm:$0xff] (!%p2287_p10)  }
  0xb6   : > { %2517 = vmatprep.mubr.bf16.mxu0 (!%p2287_p10), %v2865_v20  ;;  %2505 = vmatprep.subr.bf16.mxu0 (!%p2287_p10), %v2298_v21  ;;  %v2867_v28 = vld [vmem:[#allocation9 + $0x10] sm:$0xff] (!%p2287_p10)   ;;  %v2868_v29 = vld [vmem:[#allocation9 + $0x18] sm:$0xff] (!%p2287_p10)   ;;  %v2869_v30 = vld [vmem:[#allocation9 + $0x20] sm:$0xff] (!%p2287_p10)  }
  0xb7   : > { %v2870_v31 = vld [vmem:[#allocation9 + $0x28] sm:$0xff] (!%p2287_p10)   ;;  %v2871_v32 = vld [vmem:[#allocation9 + $0x30] sm:$0xff] (!%p2287_p10)   ;;  %v2872_v33 = vld [vmem:[#allocation9 + $0x38] sm:$0xff] (!%p2287_p10)  }
  0xb8   : > { %v2873_v34 = vld [vmem:[#allocation6] sm:$0xff] (!%p2287_p10)   ;;  %v2874_v59 = vld [vmem:[#allocation6 + $0x8] sm:$0xff] (!%p2287_p10)   ;;  %v2875_v60 = vld [vmem:[#allocation6 + $0x10] sm:$0xff] (!%p2287_p10)  }
  0xb9   : > { %2506 = vmatpush3.bf16.msra.mxu0 (!%p2287_p10), %v2298_v21  ;;  %2549 = vmatprep.mubr.bf16.mxu1 (!%p2287_p10), %v2873_v34  ;;  %v2876_v61 = vld [vmem:[#allocation6 + $0x18] sm:$0xff] (!%p2287_p10)   ;;  %v2877_v62 = vld [vmem:[#allocation6 + $0x20] sm:$0xff] (!%p2287_p10)   ;;  %v2878_v63 = vld [vmem:[#allocation6 + $0x28] sm:$0xff] (!%p2287_p10)  }
  0xba   : > { %2507 = vmatprep.subr.bf16.mxu0 (!%p2287_p10), %v2299_v22  ;;  %v2879_v0 = vld [vmem:[#allocation6 + $0x30] sm:$0xff] (!%p2287_p10)   ;;  %v2880_v3 = vld [vmem:[#allocation6 + $0x38] sm:$0xff] (!%p2287_p10)   ;;  %v754_v18 = vld [vmem:[#allocation2 + $0x10] sm:$0xff] (!%p2287_p10) }
  0xbb   : > { %v752_v19 = vld [vmem:[#allocation2] sm:$0xff] (!%p2287_p10)  ;;  %v755_v21 = vld [vmem:[#allocation2 + $0x18] sm:$0xff] (!%p2287_p10) }
  0xbd   : > { %2508 = vmatpush3.bf16.msra.mxu0 %v2299_v22 }
  0xbe   : > { %2509 = vmatprep.subr.bf16.mxu0 %v2300_v23 }
  0xc1   : > { %2510 = vmatpush3.bf16.msra.mxu0 %v2300_v23 }
  0xc2   : > { %2511 = vmatprep.subr.bf16.mxu0 %v2301_v24 }
  0xc5   : > { %2512 = vmatpush3.bf16.msra.mxu0 %v2301_v24  ;;  %v753_v24 = vld [vmem:[#allocation2 + $0x8] sm:$0xff] }
  0xc6   : > { %2513 = vmatprep.subr.bf16.mxu0 %v2302_v25 }
  0xc9   : > { %2514 = vmatpush3.bf16.msra.mxu0 %v2302_v25 }
  0xca   : > { %2515 = vmatprep.subr.bf16.mxu0 %v2303_v26 }
  0xcd   : > { %2516 = vmatpush3.bf16.msra.mxu0 %v2303_v26 }
  0xd0   : > { %2518 = vmatmul.mubr.bf16.vlgmr.msra.gmra.mrb[0].mxu0 %v2866_v27 }
  0xd1   : > { %2521 = vmatprep.mubr.bf16.mxu0 %v2867_v28 }
  0xd8   : > { %2522 = vmatmul.mubr.bf16.gmra.mrb[4].mxu0 %v2868_v29 }
  0xd9   : > { %2525 = vmatprep.mubr.bf16.mxu0 %v2869_v30  ;;  %v758_v30 = vld [vmem:[#allocation2 + $0x30] sm:$0xff] }
  0xe0   : > { %2526 = vmatmul.mubr.bf16.gmra.mrb[8].mxu0 %v2870_v31  ;;  %v756_v31 = vld [vmem:[#allocation2 + $0x20] sm:$0xff] }
  0xe1   : > { %2529 = vmatprep.mubr.bf16.mxu0 %v2871_v32 }
  0xe8   : > { %2530 = vmatmul.mubr.bf16.gmra.mrb[12].mxu0 %v2872_v33  ;;  %v759_v33 = vld [vmem:[#allocation2 + $0x38] sm:$0xff] }
 0x1a3   : > { %v2519_v35 = vpop.f32.mrb[0].mxu0 }
 0x1a4   : > { %v689_v36 = vpop.f32.mrb[1].mxu0 }
 0x1a5   : > { %v2520_v37 = vpop.f32.mrb[2].mxu0 }
 0x1a6   : > { %v785_v38 = vpack.c.bf16 %v2520_v37, %v2519_v35  ;;  %v692_v39 = vpop.f32.mrb[3].mxu0 }
 0x1a7   : > { %v784_v40 = vpack.c.bf16 %v692_v39, %v689_v36  ;;  %v757_v36 = vld [vmem:[#allocation2 + $0x28] sm:$0xff] }
 0x1a9   : > { %2533 = vmatprep.subr.bf16.mxu1 %v784_v40 }
 0x1aa   : > { %2534 = vmatpush3.bf16.msra.mxu1 %v784_v40 }
 0x1ab   : > { %v2523_v41 = vpop.f32.mrb[4].mxu0  ;;  %2535 = vmatprep.subr.bf16.mxu1 %v785_v38 }
 0x1ac   : > { %v705_v42 = vpop.f32.mrb[5].mxu0 }
 0x1ad   : > { %v2524_v43 = vpop.f32.mrb[6].mxu0 }
 0x1ae   : > { %v787_v44 = vpack.c.bf16 %v2524_v43, %v2523_v41  ;;  %v708_v45 = vpop.f32.mrb[7].mxu0  ;;  %2536 = vmatpush3.bf16.msra.mxu1 %v785_v38  ;;  %v760_v43 = vld [vmem:[#allocation2 + $0x40] sm:$0xff] }
 0x1af   : > { %v786_v46 = vpack.c.bf16 %v708_v45, %v705_v42  ;;  %v762_v42 = vld [vmem:[#allocation2 + $0x50] sm:$0xff]  ;;  %v763_v45 = vld [vmem:[#allocation2 + $0x58] sm:$0xff] }
 0x1b1   : > { %2537 = vmatprep.subr.bf16.mxu1 %v786_v46 }
 0x1b2   : > { %2538 = vmatpush3.bf16.msra.mxu1 %v786_v46 }
 0x1b3   : > { %v2527_v47 = vpop.f32.mrb[8].mxu0  ;;  %2539 = vmatprep.subr.bf16.mxu1 %v787_v44 }
 0x1b4   : > { %v721_v48 = vpop.f32.mrb[9].mxu0 }
 0x1b5   : > { %v2528_v49 = vpop.f32.mrb[10].mxu0 }
 0x1b6   : > { %v789_v50 = vpack.c.bf16 %v2528_v49, %v2527_v47  ;;  %v724_v51 = vpop.f32.mrb[11].mxu0  ;;  %2540 = vmatpush3.bf16.msra.mxu1 %v787_v44 }
 0x1b7   : > { %v788_v52 = vpack.c.bf16 %v724_v51, %v721_v48  ;;  %v761_v48 = vld [vmem:[#allocation2 + $0x48] sm:$0xff] }
 0x1b9   : > { %2541 = vmatprep.subr.bf16.mxu1 %v788_v52 }
 0x1ba   : > { %2542 = vmatpush3.bf16.msra.mxu1 %v788_v52 }
 0x1bb   : > { %v2531_v53 = vpop.f32.mrb[12].mxu0  ;;  %2543 = vmatprep.subr.bf16.mxu1 %v789_v50 }
 0x1bc   : > { %v737_v54 = vpop.f32.mrb[13].mxu0 }
 0x1bd   : > { %v2532_v55 = vpop.f32.mrb[14].mxu0 }
 0x1be   : > { %v791_v56 = vpack.c.bf16 %v2532_v55, %v2531_v53  ;;  %v740_v57 = vpop.f32.mrb[15].mxu0  ;;  %2544 = vmatpush3.bf16.msra.mxu1 %v789_v50  ;;  %v764_v55 = vld [vmem:[#allocation2 + $0x60] sm:$0xff] }
 0x1bf   : > { %v790_v58 = vpack.c.bf16 %v740_v57, %v737_v54  ;;  %v766_v54 = vld [vmem:[#allocation2 + $0x70] sm:$0xff]  ;;  %v767_v57 = vld [vmem:[#allocation2 + $0x78] sm:$0xff] }
 0x1c1   : > { %2545 = vmatprep.subr.bf16.mxu1 %v790_v58 }
 0x1c2   : > { %2546 = vmatpush3.bf16.msra.mxu1 %v790_v58 }
 0x1c3   : > { %2547 = vmatprep.subr.bf16.mxu1 %v791_v56 }
 0x1c6   : > { %2548 = vmatpush3.bf16.msra.mxu1 %v791_v56 }
 0x1c9   : > { %2550 = vmatmul.mubr.bf16.vlgmr.msra.gmra.mrb[0].mxu1 %v2874_v59 }
 0x1ca   : > { %2553 = vmatprep.mubr.bf16.mxu1 %v2875_v60  ;;  %v765_v60 = vld [vmem:[#allocation2 + $0x68] sm:$0xff] }
 0x1d1   : > { %2554 = vmatmul.mubr.bf16.gmra.mrb[4].mxu1 %v2876_v61 }
 0x1d2   : > { %2557 = vmatprep.mubr.bf16.mxu1 %v2877_v62 }
 0x1d9   : > { %2558 = vmatmul.mubr.bf16.gmra.mrb[8].mxu1 %v2878_v63 }
 0x1da   : > { %2561 = vmatprep.mubr.bf16.mxu1 %v2879_v0 }
 0x1e1   : > { %2562 = vmatmul.mubr.bf16.gmra.mrb[12].mxu1 %v2880_v3 }
 0x29c   : > { %v2551_v20 = vpop.f32.mrb[0].mxu1 }
 0x29d   : > { %v939_v22 = vadd.f32 %v2551_v20, %v754_v18  ;;  %v874_v23 = vpop.f32.mrb[1].mxu1 }
 0x29e   : > { %v937_v25 = vadd.f32 %v874_v23, %v752_v19  ;;  %v2552_v26 = vpop.f32.mrb[2].mxu1 }
 0x29f   : > { %955 = vst [vmem:[#allocation2 + $0x10] sm:$0xff] %v939_v22  ;;  %v940_v27 = vadd.f32 %v2552_v26, %v755_v21  ;;  %v877_v28 = vpop.f32.mrb[3].mxu1 }
 0x2a0   : > { %953 = vst [vmem:[#allocation2] sm:$0xff] %v937_v25  ;;  %v938_v29 = vadd.f32 %v877_v28, %v753_v24 }
 0x2a1   : > { %956 = vst [vmem:[#allocation2 + $0x18] sm:$0xff] %v940_v27 }
 0x2a2   : > { %954 = vst [vmem:[#allocation2 + $0x8] sm:$0xff] %v938_v29 }
 0x2a4   : > { %v2555_v32 = vpop.f32.mrb[4].mxu1 }
 0x2a5   : > { %v943_v34 = vadd.f32 %v2555_v32, %v758_v30  ;;  %v890_v35 = vpop.f32.mrb[5].mxu1 }
 0x2a6   : > { %v941_v37 = vadd.f32 %v890_v35, %v756_v31  ;;  %v2556_v38 = vpop.f32.mrb[6].mxu1 }
 0x2a7   : > { %959 = vst [vmem:[#allocation2 + $0x30] sm:$0xff] %v943_v34  ;;  %v944_v39 = vadd.f32 %v2556_v38, %v759_v33  ;;  %v893_v40 = vpop.f32.mrb[7].mxu1 }
 0x2a8   : > { %957 = vst [vmem:[#allocation2 + $0x20] sm:$0xff] %v941_v37  ;;  %v942_v41 = vadd.f32 %v893_v40, %v757_v36 }
 0x2a9   : > { %960 = vst [vmem:[#allocation2 + $0x38] sm:$0xff] %v944_v39 }
 0x2aa   : > { %958 = vst [vmem:[#allocation2 + $0x28] sm:$0xff] %v942_v41 }
 0x2ac   : > { %v2559_v44 = vpop.f32.mrb[8].mxu1 }
 0x2ad   : > { %v947_v46 = vadd.f32 %v2559_v44, %v762_v42  ;;  %v906_v47 = vpop.f32.mrb[9].mxu1 }
 0x2ae   : > { %v945_v49 = vadd.f32 %v906_v47, %v760_v43  ;;  %v2560_v50 = vpop.f32.mrb[10].mxu1 }
 0x2af   : > { %963 = vst [vmem:[#allocation2 + $0x50] sm:$0xff] %v947_v46  ;;  %v948_v51 = vadd.f32 %v2560_v50, %v763_v45  ;;  %v909_v52 = vpop.f32.mrb[11].mxu1 }
 0x2b0   : > { %961 = vst [vmem:[#allocation2 + $0x40] sm:$0xff] %v945_v49  ;;  %v946_v53 = vadd.f32 %v909_v52, %v761_v48 }
 0x2b1   : > { %964 = vst [vmem:[#allocation2 + $0x58] sm:$0xff] %v948_v51 }
 0x2b2   : > { %962 = vst [vmem:[#allocation2 + $0x48] sm:$0xff] %v946_v53 }
 0x2b4   : > { %v2563_v56 = vpop.f32.mrb[12].mxu1 }
 0x2b5   : > { %v951_v58 = vadd.f32 %v2563_v56, %v766_v54  ;;  %v922_v59 = vpop.f32.mrb[13].mxu1 }
 0x2b6   : > { %v949_v61 = vadd.f32 %v922_v59, %v764_v55  ;;  %v2564_v62 = vpop.f32.mrb[14].mxu1 }
 0x2b7   : > { %967 = vst [vmem:[#allocation2 + $0x70] sm:$0xff] %v951_v58  ;;  %v952_v63 = vadd.f32 %v2564_v62, %v767_v57  ;;  %v925_v0 = vpop.f32.mrb[15].mxu1 }
 0x2b8   : > { %965 = vst [vmem:[#allocation2 + $0x60] sm:$0xff] %v949_v61  ;;  %v950_v3 = vadd.f32 %v925_v0, %v765_v60 }
 0x2b9   : > { %968 = vst [vmem:[#allocation2 + $0x78] sm:$0xff] %v952_v63 }
 0x2ba   : > { %966 = vst [vmem:[#allocation2 + $0x68] sm:$0xff] %v950_v3 }
 0x2bb PF: > { %p970_p1 = scmp.lt.s32.totalorder %s3144_s16, 0  ;;  %s971_s25 = ssub.s32 0, %s3144_s16 }
 0x2bc   : > { %s2312_s9 = smin.u32 %s3144_s16, %s971_s25  ;;  %p969_p8 = scmp.gt.s32.totalorder %s3144_s16, 0 }
 0x2bd   : > { %s973_s29 = sand.u32 1, %s2312_s9  }
 0x2be   : > { %s974_s7 = ssub.s32 0, %s973_s29 }
 0x2bf   : > { %s3699_s7 = smov (!%p970_p1, %s974_s7), %s973_s29 }
 0x2c0   : > { %p2314_p3 = scmp.lt.s32.totalorder %s3699_s7, 0  ;;  %s980_s28 = sadd.s32 2, %s3699_s7 }
 0x2c2   : > { %s3701_s28 = smov (!%p2314_p3, %s980_s28), %s3699_s7 }
 0x2c3   : > { %p982_p11 = scmp.eq.s32.totalorder %s3701_s28, 1 }
 0x2c5   : > { %p983_p9 = pnand %p982_p11, %p969_p8 }
 0x2c6   : > { %v2315_v18 = vcombine.low (!%p983_p9), %v3480_v1, %v3483_v2  ;;  %v2316_v19 = vcombine.low (!%p983_p9), %v3486_v4, %v3489_v5  ;;  %v991_v20 = vld [vmem:[#allocation4] sm:$0xff] (!%p983_p9)  ;;  %v2317_v21 = vcombine.low (!%p983_p9), %v3492_v6, %v3495_v7  ;;  %v2318_v22 = vcombine.low (!%p983_p9), %v3498_v8, %v3501_v9  ;;  %v992_v27 = vld [vmem:[#allocation4 + $0x8] sm:$0xff] (!%p983_p9)  ;;  %v993_v28 = vld [vmem:[#allocation4 + $0x10] sm:$0xff] (!%p983_p9) }
 0x2c7   : > { %986 = sbr.rel (%p983_p9) target bundleno = 1235 (0x4d3), region = 96  ;;  %2581 = vmatprep.mubr.bf16.mxu0 (!%p983_p9), %v991_v20  ;;  %v2319_v23 = vcombine.low (!%p983_p9), %v3504_v10, %v3507_v11  ;;  %v2320_v24 = vcombine.low (!%p983_p9), %v3510_v12, %v3513_v13  ;;  %v2321_v25 = vcombine.low (!%p983_p9), %v3516_v14, %v3519_v15  ;;  %v2322_v26 = vcombine.low (!%p983_p9), %v3522_v16, %v3525_v17  ;;  %v994_v29 = vld [vmem:[#allocation4 + $0x18] sm:$0xff] (!%p983_p9)  ;;  %v995_v30 = vld [vmem:[#allocation4 + $0x20] sm:$0xff] (!%p983_p9)  ;;  %v996_v31 = vld [vmem:[#allocation4 + $0x28] sm:$0xff] (!%p983_p9) }
 0x2c8   : > { %2565 = vmatprep.subr.bf16.mxu0 (!%p983_p9), %v2315_v18  ;;  %v997_v32 = vld [vmem:[#allocation4 + $0x30] sm:$0xff] (!%p983_p9)  ;;  %v998_v33 = vld [vmem:[#allocation4 + $0x38] sm:$0xff] (!%p983_p9)  ;;  %v2881_v34 = vld [vmem:[#allocation6] sm:$0xff] (!%p983_p9)  }
 0x2c9   : > { %2566 = vmatpush3.bf16.msra.mxu0 (!%p983_p9), %v2315_v18  ;;  %2613 = vmatprep.mubr.bf16.mxu1 (!%p983_p9), %v2881_v34  ;;  %v2882_v59 = vld [vmem:[#allocation6 + $0x8] sm:$0xff] (!%p983_p9)   ;;  %v2883_v60 = vld [vmem:[#allocation6 + $0x10] sm:$0xff] (!%p983_p9)   ;;  %v2884_v61 = vld [vmem:[#allocation6 + $0x18] sm:$0xff] (!%p983_p9)  }
 0x2ca   : > { %2567 = vmatprep.subr.bf16.mxu0 (!%p983_p9), %v2316_v19  ;;  %v2885_v62 = vld [vmem:[#allocation6 + $0x20] sm:$0xff] (!%p983_p9)   ;;  %v2886_v63 = vld [vmem:[#allocation6 + $0x28] sm:$0xff] (!%p983_p9)   ;;  %v2887_v0 = vld [vmem:[#allocation6 + $0x30] sm:$0xff] (!%p983_p9)  }
 0x2cb   : > { %v2888_v3 = vld [vmem:[#allocation6 + $0x38] sm:$0xff] (!%p983_p9)   ;;  %v1146_v18 = vld [vmem:[#allocation2 + $0x10] sm:$0xff] (!%p983_p9) }
 0x2cd   : > { %2568 = vmatpush3.bf16.msra.mxu0 (!%p983_p9), %v2316_v19  ;;  %v1144_v19 = vld [vmem:[#allocation2] sm:$0xff] (!%p983_p9) }
 0x2ce   : > { %2569 = vmatprep.subr.bf16.mxu0 %v2317_v21 }
 0x2d1   : > { %2570 = vmatpush3.bf16.msra.mxu0 %v2317_v21  ;;  %v1147_v21 = vld [vmem:[#allocation2 + $0x18] sm:$0xff] }
 0x2d2   : > { %2571 = vmatprep.subr.bf16.mxu0 %v2318_v22 }
 0x2d5   : > { %2572 = vmatpush3.bf16.msra.mxu0 %v2318_v22 }
 0x2d6   : > { %2573 = vmatprep.subr.bf16.mxu0 %v2319_v23 }
 0x2d9   : > { %2574 = vmatpush3.bf16.msra.mxu0 %v2319_v23 }
 0x2da   : > { %2575 = vmatprep.subr.bf16.mxu0 %v2320_v24 }
 0x2dd   : > { %2576 = vmatpush3.bf16.msra.mxu0 %v2320_v24  ;;  %v1145_v24 = vld [vmem:[#allocation2 + $0x8] sm:$0xff] }
 0x2de   : > { %2577 = vmatprep.subr.bf16.mxu0 %v2321_v25 }
 0x2e1   : > { %2578 = vmatpush3.bf16.msra.mxu0 %v2321_v25 }
 0x2e2   : > { %2579 = vmatprep.subr.bf16.mxu0 %v2322_v26 }
 0x2e5   : > { %2580 = vmatpush3.bf16.msra.mxu0 %v2322_v26 }
 0x2e8   : > { %2582 = vmatmul.mubr.bf16.vlgmr.msra.gmra.mrb[0].mxu0 %v992_v27 }
 0x2e9   : > { %2585 = vmatprep.mubr.bf16.mxu0 %v993_v28 }
 0x2f0   : > { %2586 = vmatmul.mubr.bf16.gmra.mrb[4].mxu0 %v994_v29 }
 0x2f1   : > { %2589 = vmatprep.mubr.bf16.mxu0 %v995_v30  ;;  %v1150_v30 = vld [vmem:[#allocation2 + $0x30] sm:$0xff] }
 0x2f8   : > { %2590 = vmatmul.mubr.bf16.gmra.mrb[8].mxu0 %v996_v31  ;;  %v1148_v31 = vld [vmem:[#allocation2 + $0x20] sm:$0xff] }
 0x2f9   : > { %2593 = vmatprep.mubr.bf16.mxu0 %v997_v32 }
 0x300   : > { %2594 = vmatmul.mubr.bf16.gmra.mrb[12].mxu0 %v998_v33  ;;  %v1151_v33 = vld [vmem:[#allocation2 + $0x38] sm:$0xff] }
 0x3bb   : > { %v2583_v35 = vpop.f32.mrb[0].mxu0 }
 0x3bc   : > { %v1081_v36 = vpop.f32.mrb[1].mxu0 }
 0x3bd   : > { %v2584_v37 = vpop.f32.mrb[2].mxu0 }
 0x3be   : > { %v1177_v38 = vpack.c.bf16 %v2584_v37, %v2583_v35  ;;  %v1084_v39 = vpop.f32.mrb[3].mxu0 }
 0x3bf   : > { %v1176_v40 = vpack.c.bf16 %v1084_v39, %v1081_v36  ;;  %v1149_v36 = vld [vmem:[#allocation2 + $0x28] sm:$0xff] }
 0x3c1   : > { %2597 = vmatprep.subr.bf16.mxu1 %v1176_v40 }
 0x3c2   : > { %2598 = vmatpush3.bf16.msra.mxu1 %v1176_v40 }
 0x3c3   : > { %v2587_v41 = vpop.f32.mrb[4].mxu0  ;;  %2599 = vmatprep.subr.bf16.mxu1 %v1177_v38 }
 0x3c4   : > { %v1097_v42 = vpop.f32.mrb[5].mxu0 }
 0x3c5   : > { %v2588_v43 = vpop.f32.mrb[6].mxu0 }
 0x3c6   : > { %v1179_v44 = vpack.c.bf16 %v2588_v43, %v2587_v41  ;;  %v1100_v45 = vpop.f32.mrb[7].mxu0  ;;  %2600 = vmatpush3.bf16.msra.mxu1 %v1177_v38  ;;  %v1152_v43 = vld [vmem:[#allocation2 + $0x40] sm:$0xff] }
 0x3c7   : > { %v1178_v46 = vpack.c.bf16 %v1100_v45, %v1097_v42  ;;  %v1154_v42 = vld [vmem:[#allocation2 + $0x50] sm:$0xff]  ;;  %v1155_v45 = vld [vmem:[#allocation2 + $0x58] sm:$0xff] }
 0x3c9   : > { %2601 = vmatprep.subr.bf16.mxu1 %v1178_v46 }
 0x3ca   : > { %2602 = vmatpush3.bf16.msra.mxu1 %v1178_v46 }
 0x3cb   : > { %v2591_v47 = vpop.f32.mrb[8].mxu0  ;;  %2603 = vmatprep.subr.bf16.mxu1 %v1179_v44 }
 0x3cc   : > { %v1113_v48 = vpop.f32.mrb[9].mxu0 }
 0x3cd   : > { %v2592_v49 = vpop.f32.mrb[10].mxu0 }
 0x3ce   : > { %v1181_v50 = vpack.c.bf16 %v2592_v49, %v2591_v47  ;;  %v1116_v51 = vpop.f32.mrb[11].mxu0  ;;  %2604 = vmatpush3.bf16.msra.mxu1 %v1179_v44 }
 0x3cf   : > { %v1180_v52 = vpack.c.bf16 %v1116_v51, %v1113_v48  ;;  %v1153_v48 = vld [vmem:[#allocation2 + $0x48] sm:$0xff] }
 0x3d1   : > { %2605 = vmatprep.subr.bf16.mxu1 %v1180_v52 }
 0x3d2   : > { %2606 = vmatpush3.bf16.msra.mxu1 %v1180_v52 }
 0x3d3   : > { %v2595_v53 = vpop.f32.mrb[12].mxu0  ;;  %2607 = vmatprep.subr.bf16.mxu1 %v1181_v50 }
 0x3d4   : > { %v1129_v54 = vpop.f32.mrb[13].mxu0 }
 0x3d5   : > { %v2596_v55 = vpop.f32.mrb[14].mxu0 }
 0x3d6   : > { %v1183_v56 = vpack.c.bf16 %v2596_v55, %v2595_v53  ;;  %v1132_v57 = vpop.f32.mrb[15].mxu0  ;;  %2608 = vmatpush3.bf16.msra.mxu1 %v1181_v50  ;;  %v1156_v55 = vld [vmem:[#allocation2 + $0x60] sm:$0xff] }
 0x3d7   : > { %v1182_v58 = vpack.c.bf16 %v1132_v57, %v1129_v54  ;;  %v1158_v54 = vld [vmem:[#allocation2 + $0x70] sm:$0xff]  ;;  %v1159_v57 = vld [vmem:[#allocation2 + $0x78] sm:$0xff] }
 0x3d9   : > { %2609 = vmatprep.subr.bf16.mxu1 %v1182_v58 }
 0x3da   : > { %2610 = vmatpush3.bf16.msra.mxu1 %v1182_v58 }
 0x3db   : > { %2611 = vmatprep.subr.bf16.mxu1 %v1183_v56 }
 0x3de   : > { %2612 = vmatpush3.bf16.msra.mxu1 %v1183_v56 }
 0x3e1   : > { %2614 = vmatmul.mubr.bf16.vlgmr.msra.gmra.mrb[0].mxu1 %v2882_v59 }
 0x3e2   : > { %2617 = vmatprep.mubr.bf16.mxu1 %v2883_v60  ;;  %v1157_v60 = vld [vmem:[#allocation2 + $0x68] sm:$0xff] }
 0x3e9   : > { %2618 = vmatmul.mubr.bf16.gmra.mrb[4].mxu1 %v2884_v61 }
 0x3ea   : > { %2621 = vmatprep.mubr.bf16.mxu1 %v2885_v62 }
 0x3f1   : > { %2622 = vmatmul.mubr.bf16.gmra.mrb[8].mxu1 %v2886_v63 }
 0x3f2   : > { %2625 = vmatprep.mubr.bf16.mxu1 %v2887_v0 }
 0x3f9   : > { %2626 = vmatmul.mubr.bf16.gmra.mrb[12].mxu1 %v2888_v3 }
 0x4b4   : > { %v2615_v20 = vpop.f32.mrb[0].mxu1 }
 0x4b5   : > { %v1331_v22 = vadd.f32 %v2615_v20, %v1146_v18  ;;  %v1266_v23 = vpop.f32.mrb[1].mxu1 }
 0x4b6   : > { %v1329_v25 = vadd.f32 %v1266_v23, %v1144_v19  ;;  %v2616_v26 = vpop.f32.mrb[2].mxu1 }
 0x4b7   : > { %1347 = vst [vmem:[#allocation2 + $0x10] sm:$0xff] %v1331_v22  ;;  %v1332_v27 = vadd.f32 %v2616_v26, %v1147_v21  ;;  %v1269_v28 = vpop.f32.mrb[3].mxu1 }
 0x4b8   : > { %1345 = vst [vmem:[#allocation2] sm:$0xff] %v1329_v25  ;;  %v1330_v29 = vadd.f32 %v1269_v28, %v1145_v24 }
 0x4b9   : > { %1348 = vst [vmem:[#allocation2 + $0x18] sm:$0xff] %v1332_v27 }
 0x4ba   : > { %1346 = vst [vmem:[#allocation2 + $0x8] sm:$0xff] %v1330_v29 }
 0x4bc   : > { %v2619_v32 = vpop.f32.mrb[4].mxu1 }
 0x4bd   : > { %v1335_v34 = vadd.f32 %v2619_v32, %v1150_v30  ;;  %v1282_v35 = vpop.f32.mrb[5].mxu1 }
 0x4be   : > { %v1333_v37 = vadd.f32 %v1282_v35, %v1148_v31  ;;  %v2620_v38 = vpop.f32.mrb[6].mxu1 }
 0x4bf   : > { %1351 = vst [vmem:[#allocation2 + $0x30] sm:$0xff] %v1335_v34  ;;  %v1336_v39 = vadd.f32 %v2620_v38, %v1151_v33  ;;  %v1285_v40 = vpop.f32.mrb[7].mxu1 }
 0x4c0   : > { %1349 = vst [vmem:[#allocation2 + $0x20] sm:$0xff] %v1333_v37  ;;  %v1334_v41 = vadd.f32 %v1285_v40, %v1149_v36 }
 0x4c1   : > { %1352 = vst [vmem:[#allocation2 + $0x38] sm:$0xff] %v1336_v39 }
 0x4c2   : > { %1350 = vst [vmem:[#allocation2 + $0x28] sm:$0xff] %v1334_v41 }
 0x4c4   : > { %v2623_v44 = vpop.f32.mrb[8].mxu1 }
 0x4c5   : > { %v1339_v46 = vadd.f32 %v2623_v44, %v1154_v42  ;;  %v1298_v47 = vpop.f32.mrb[9].mxu1 }
 0x4c6   : > { %v1337_v49 = vadd.f32 %v1298_v47, %v1152_v43  ;;  %v2624_v50 = vpop.f32.mrb[10].mxu1 }
 0x4c7   : > { %1355 = vst [vmem:[#allocation2 + $0x50] sm:$0xff] %v1339_v46  ;;  %v1340_v51 = vadd.f32 %v2624_v50, %v1155_v45  ;;  %v1301_v52 = vpop.f32.mrb[11].mxu1 }
 0x4c8   : > { %1353 = vst [vmem:[#allocation2 + $0x40] sm:$0xff] %v1337_v49  ;;  %v1338_v53 = vadd.f32 %v1301_v52, %v1153_v48 }
 0x4c9   : > { %1356 = vst [vmem:[#allocation2 + $0x58] sm:$0xff] %v1340_v51 }
 0x4ca   : > { %1354 = vst [vmem:[#allocation2 + $0x48] sm:$0xff] %v1338_v53 }
 0x4cc   : > { %v2627_v56 = vpop.f32.mrb[12].mxu1 }
 0x4cd   : > { %v1343_v58 = vadd.f32 %v2627_v56, %v1158_v54  ;;  %v1314_v59 = vpop.f32.mrb[13].mxu1 }
 0x4ce   : > { %v1341_v61 = vadd.f32 %v1314_v59, %v1156_v55  ;;  %v2628_v62 = vpop.f32.mrb[14].mxu1 }
 0x4cf   : > { %1359 = vst [vmem:[#allocation2 + $0x70] sm:$0xff] %v1343_v58  ;;  %v1344_v63 = vadd.f32 %v2628_v62, %v1159_v57  ;;  %v1317_v0 = vpop.f32.mrb[15].mxu1 }
 0x4d0   : > { %1357 = vst [vmem:[#allocation2 + $0x60] sm:$0xff] %v1341_v61  ;;  %v1342_v3 = vadd.f32 %v1317_v0, %v1157_v60 }
 0x4d1   : > { %1360 = vst [vmem:[#allocation2 + $0x78] sm:$0xff] %v1344_v63 }
 0x4d2   : > { %1358 = vst [vmem:[#allocation2 + $0x68] sm:$0xff] %v1342_v3 }
 0x4d3 PF: > { %p1361_p4 = scmp.eq.s32.totalorder %s3701_s28, 0 }
 0x4d5   : > { %p1362_p7 = pnand %p1361_p4, %p969_p8 }
 0x4d6   : > { %v2331_v18 = vcombine.low (!%p1362_p7), %v3480_v1, %v3483_v2  ;;  %v2332_v19 = vcombine.low (!%p1362_p7), %v3486_v4, %v3489_v5  ;;  %v1370_v20 = vld [vmem:[#allocation5] sm:$0xff] (!%p1362_p7)  ;;  %v2333_v21 = vcombine.low (!%p1362_p7), %v3492_v6, %v3495_v7  ;;  %v2334_v22 = vcombine.low (!%p1362_p7), %v3498_v8, %v3501_v9  ;;  %v1371_v6 = vld [vmem:[#allocation5 + $0x8] sm:$0xff] (!%p1362_p7)  ;;  %v1372_v7 = vld [vmem:[#allocation5 + $0x10] sm:$0xff] (!%p1362_p7) }
 0x4d7   : > { %1365 = sbr.rel (%p1362_p7) target bundleno = 1763 (0x6e3), region = 100  ;;  %2645 = vmatprep.mubr.bf16.mxu0 (!%p1362_p7), %v1370_v20  ;;  %v2335_v1 = vcombine.low (!%p1362_p7), %v3504_v10, %v3507_v11  ;;  %v2336_v2 = vcombine.low (!%p1362_p7), %v3510_v12, %v3513_v13  ;;  %v2337_v4 = vcombine.low (!%p1362_p7), %v3516_v14, %v3519_v15  ;;  %v2338_v5 = vcombine.low (!%p1362_p7), %v3522_v16, %v3525_v17  ;;  %v1373_v8 = vld [vmem:[#allocation5 + $0x18] sm:$0xff] (!%p1362_p7)  ;;  %v1374_v9 = vld [vmem:[#allocation5 + $0x20] sm:$0xff] (!%p1362_p7)  ;;  %v1375_v10 = vld [vmem:[#allocation5 + $0x28] sm:$0xff] (!%p1362_p7) }
 0x4d8   : > { %2629 = vmatprep.subr.bf16.mxu0 (!%p1362_p7), %v2331_v18  ;;  %v1376_v11 = vld [vmem:[#allocation5 + $0x30] sm:$0xff] (!%p1362_p7)  ;;  %v1377_v12 = vld [vmem:[#allocation5 + $0x38] sm:$0xff] (!%p1362_p7)  ;;  %v2889_v13 = vld [vmem:[#allocation6] sm:$0xff] (!%p1362_p7)  }
 0x4d9   : > { %2630 = vmatpush3.bf16.msra.mxu0 (!%p1362_p7), %v2331_v18  ;;  %2677 = vmatprep.mubr.bf16.mxu1 (!%p1362_p7), %v2889_v13  ;;  %v2890_v43 = vld [vmem:[#allocation6 + $0x8] sm:$0xff] (!%p1362_p7)   ;;  %v2891_v44 = vld [vmem:[#allocation6 + $0x10] sm:$0xff] (!%p1362_p7)   ;;  %v2892_v45 = vld [vmem:[#allocation6 + $0x18] sm:$0xff] (!%p1362_p7)  }
 0x4da   : > { %2631 = vmatprep.subr.bf16.mxu0 (!%p1362_p7), %v2332_v19  ;;  %v2893_v46 = vld [vmem:[#allocation6 + $0x20] sm:$0xff] (!%p1362_p7)   ;;  %v2894_v47 = vld [vmem:[#allocation6 + $0x28] sm:$0xff] (!%p1362_p7)   ;;  %v2895_v48 = vld [vmem:[#allocation6 + $0x30] sm:$0xff] (!%p1362_p7)  }
 0x4db   : > { %v2896_v49 = vld [vmem:[#allocation6 + $0x38] sm:$0xff] (!%p1362_p7)   ;;  %v1525_v50 = vld [vmem:[#allocation2 + $0x10] sm:$0xff] (!%p1362_p7)  ;;  %v1526_v53 = vld [vmem:[#allocation2 + $0x18] sm:$0xff] (!%p1362_p7) }
 0x4dc   : > { %v1523_v51 = vld [vmem:[#allocation2] sm:$0xff] (!%p1362_p7)  ;;  %v1524_v56 = vld [vmem:[#allocation2 + $0x8] sm:$0xff] (!%p1362_p7)  ;;  %v1529_v62 = vld [vmem:[#allocation2 + $0x30] sm:$0xff] (!%p1362_p7) }
 0x4dd   : > { %2632 = vmatpush3.bf16.msra.mxu0 (!%p1362_p7), %v2332_v19  ;;  %v1527_v63 = vld [vmem:[#allocation2 + $0x20] sm:$0xff] (!%p1362_p7)  ;;  %v1530_v3 = vld [vmem:[#allocation2 + $0x38] sm:$0xff] (!%p1362_p7)  ;;  %v1528_v20 = vld [vmem:[#allocation2 + $0x28] sm:$0xff] (!%p1362_p7) }
 0x4de   : > { %2633 = vmatprep.subr.bf16.mxu0 %v2333_v21 }
 0x4e1   : > { %2634 = vmatpush3.bf16.msra.mxu0 %v2333_v21 }
 0x4e2   : > { %2635 = vmatprep.subr.bf16.mxu0 %v2334_v22 }
 0x4e5   : > { %2636 = vmatpush3.bf16.msra.mxu0 %v2334_v22 }
 0x4e6   : > { %2637 = vmatprep.subr.bf16.mxu0 %v2335_v1 }
 0x4e9   : > { %2638 = vmatpush3.bf16.msra.mxu0 %v2335_v1 }
 0x4ea   : > { %2639 = vmatprep.subr.bf16.mxu0 %v2336_v2 }
 0x4ed   : > { %2640 = vmatpush3.bf16.msra.mxu0 %v2336_v2 }
 0x4ee   : > { %2641 = vmatprep.subr.bf16.mxu0 %v2337_v4 }
 0x4f1   : > { %2642 = vmatpush3.bf16.msra.mxu0 %v2337_v4 }
 0x4f2   : > { %2643 = vmatprep.subr.bf16.mxu0 %v2338_v5 }
 0x4f5   : > { %2644 = vmatpush3.bf16.msra.mxu0 %v2338_v5  ;;  %v1533_v5 = vld [vmem:[#allocation2 + $0x50] sm:$0xff] }
 0x4f8   : > { %2646 = vmatmul.mubr.bf16.vlgmr.msra.gmra.mrb[0].mxu0 %v1371_v6  ;;  %v1531_v6 = vld [vmem:[#allocation2 + $0x40] sm:$0xff] }
 0x4f9   : > { %2649 = vmatprep.mubr.bf16.mxu0 %v1372_v7 }
 0x500   : > { %2650 = vmatmul.mubr.bf16.gmra.mrb[4].mxu0 %v1373_v8  ;;  %v1534_v8 = vld [vmem:[#allocation2 + $0x58] sm:$0xff] }
 0x501   : > { %2653 = vmatprep.mubr.bf16.mxu0 %v1374_v9 }
 0x508   : > { %2654 = vmatmul.mubr.bf16.gmra.mrb[8].mxu0 %v1375_v10 }
 0x509   : > { %2657 = vmatprep.mubr.bf16.mxu0 %v1376_v11  ;;  %v1532_v11 = vld [vmem:[#allocation2 + $0x48] sm:$0xff] }
 0x510   : > { %2658 = vmatmul.mubr.bf16.gmra.mrb[12].mxu0 %v1377_v12 }
 0x5cb   : > { %v2647_v14 = vpop.f32.mrb[0].mxu0 }
 0x5cc   : > { %v1460_v15 = vpop.f32.mrb[1].mxu0 }
 0x5cd   : > { %v2648_v16 = vpop.f32.mrb[2].mxu0 }
 0x5ce   : > { %v1556_v17 = vpack.c.bf16 %v2648_v16, %v2647_v14  ;;  %v1463_v23 = vpop.f32.mrb[3].mxu0 }
 0x5cf   : > { %v1555_v24 = vpack.c.bf16 %v1463_v23, %v1460_v15  ;;  %v1535_v23 = vld [vmem:[#allocation2 + $0x60] sm:$0xff] }
 0x5d1   : > { %2661 = vmatprep.subr.bf16.mxu1 %v1555_v24 }
 0x5d2   : > { %2662 = vmatpush3.bf16.msra.mxu1 %v1555_v24 }
 0x5d3   : > { %v2651_v25 = vpop.f32.mrb[4].mxu0  ;;  %2663 = vmatprep.subr.bf16.mxu1 %v1556_v17 }
 0x5d4   : > { %v1476_v26 = vpop.f32.mrb[5].mxu0 }
 0x5d5   : > { %v2652_v27 = vpop.f32.mrb[6].mxu0 }
 0x5d6   : > { %v1558_v28 = vpack.c.bf16 %v2652_v27, %v2651_v25  ;;  %v1479_v29 = vpop.f32.mrb[7].mxu0  ;;  %2664 = vmatpush3.bf16.msra.mxu1 %v1556_v17  ;;  %v1537_v17 = vld [vmem:[#allocation2 + $0x70] sm:$0xff]  ;;  %v1538_v25 = vld [vmem:[#allocation2 + $0x78] sm:$0xff] }
 0x5d7   : > { %v1557_v30 = vpack.c.bf16 %v1479_v29, %v1476_v26 }
 0x5d9   : > { %2665 = vmatprep.subr.bf16.mxu1 %v1557_v30 }
 0x5da   : > { %2666 = vmatpush3.bf16.msra.mxu1 %v1557_v30 }
 0x5db   : > { %v2655_v31 = vpop.f32.mrb[8].mxu0  ;;  %2667 = vmatprep.subr.bf16.mxu1 %v1558_v28 }
 0x5dc   : > { %v1492_v32 = vpop.f32.mrb[9].mxu0 }
 0x5dd   : > { %v2656_v33 = vpop.f32.mrb[10].mxu0 }
 0x5de   : > { %v1560_v34 = vpack.c.bf16 %v2656_v33, %v2655_v31  ;;  %v1495_v35 = vpop.f32.mrb[11].mxu0  ;;  %2668 = vmatpush3.bf16.msra.mxu1 %v1558_v28  ;;  %v1536_v28 = vld [vmem:[#allocation2 + $0x68] sm:$0xff] }
 0x5df   : > { %v1559_v36 = vpack.c.bf16 %v1495_v35, %v1492_v32 }
 0x5e1   : > { %2669 = vmatprep.subr.bf16.mxu1 %v1559_v36 }
 0x5e2   : > { %2670 = vmatpush3.bf16.msra.mxu1 %v1559_v36 }
 0x5e3   : > { %v2659_v37 = vpop.f32.mrb[12].mxu0  ;;  %2671 = vmatprep.subr.bf16.mxu1 %v1560_v34 }
 0x5e4   : > { %v1508_v38 = vpop.f32.mrb[13].mxu0 }
 0x5e5   : > { %v2660_v39 = vpop.f32.mrb[14].mxu0 }
 0x5e6   : > { %v1562_v40 = vpack.c.bf16 %v2660_v39, %v2659_v37  ;;  %v1511_v41 = vpop.f32.mrb[15].mxu0  ;;  %2672 = vmatpush3.bf16.msra.mxu1 %v1560_v34 }
 0x5e7   : > { %v1561_v42 = vpack.c.bf16 %v1511_v41, %v1508_v38 }
 0x5e9   : > { %2673 = vmatprep.subr.bf16.mxu1 %v1561_v42 }
 0x5ea   : > { %2674 = vmatpush3.bf16.msra.mxu1 %v1561_v42 }
 0x5eb   : > { %2675 = vmatprep.subr.bf16.mxu1 %v1562_v40 }
 0x5ee   : > { %2676 = vmatpush3.bf16.msra.mxu1 %v1562_v40 }
 0x5f1   : > { %2678 = vmatmul.mubr.bf16.vlgmr.msra.gmra.mrb[0].mxu1 %v2890_v43 }
 0x5f2   : > { %2681 = vmatprep.mubr.bf16.mxu1 %v2891_v44 }
 0x5f9   : > { %2682 = vmatmul.mubr.bf16.gmra.mrb[4].mxu1 %v2892_v45 }
 0x5fa   : > { %2685 = vmatprep.mubr.bf16.mxu1 %v2893_v46 }
 0x601   : > { %2686 = vmatmul.mubr.bf16.gmra.mrb[8].mxu1 %v2894_v47 }
 0x602   : > { %2689 = vmatprep.mubr.bf16.mxu1 %v2895_v48 }
 0x609   : > { %2690 = vmatmul.mubr.bf16.gmra.mrb[12].mxu1 %v2896_v49 }
 0x6c4   : > { %v2679_v52 = vpop.f32.mrb[0].mxu1 }
 0x6c5   : > { %v1710_v54 = vadd.f32 %v2679_v52, %v1525_v50  ;;  %v1645_v55 = vpop.f32.mrb[1].mxu1 }
 0x6c6   : > { %v1708_v57 = vadd.f32 %v1645_v55, %v1523_v51  ;;  %v2680_v58 = vpop.f32.mrb[2].mxu1 }
 0x6c7   : > { %1726 = vst [vmem:[#allocation2 + $0x10] sm:$0xff] %v1710_v54  ;;  %v1711_v59 = vadd.f32 %v2680_v58, %v1526_v53  ;;  %v1648_v60 = vpop.f32.mrb[3].mxu1 }
 0x6c8   : > { %1724 = vst [vmem:[#allocation2] sm:$0xff] %v1708_v57  ;;  %v1709_v61 = vadd.f32 %v1648_v60, %v1524_v56 }
 0x6c9   : > { %1727 = vst [vmem:[#allocation2 + $0x18] sm:$0xff] %v1711_v59 }
 0x6ca   : > { %1725 = vst [vmem:[#allocation2 + $0x8] sm:$0xff] %v1709_v61 }
 0x6cc   : > { %v2683_v0 = vpop.f32.mrb[4].mxu1 }
 0x6cd   : > { %v1714_v18 = vadd.f32 %v2683_v0, %v1529_v62  ;;  %v1661_v19 = vpop.f32.mrb[5].mxu1 }
 0x6ce   : > { %v1712_v21 = vadd.f32 %v1661_v19, %v1527_v63  ;;  %v2684_v22 = vpop.f32.mrb[6].mxu1 }
 0x6cf   : > { %1730 = vst [vmem:[#allocation2 + $0x30] sm:$0xff] %v1714_v18  ;;  %v1715_v1 = vadd.f32 %v2684_v22, %v1530_v3  ;;  %v1664_v2 = vpop.f32.mrb[7].mxu1 }
 0x6d0   : > { %1728 = vst [vmem:[#allocation2 + $0x20] sm:$0xff] %v1712_v21  ;;  %v1713_v4 = vadd.f32 %v1664_v2, %v1528_v20 }
 0x6d1   : > { %1731 = vst [vmem:[#allocation2 + $0x38] sm:$0xff] %v1715_v1 }
 0x6d2   : > { %1729 = vst [vmem:[#allocation2 + $0x28] sm:$0xff] %v1713_v4 }
 0x6d4   : > { %v2687_v7 = vpop.f32.mrb[8].mxu1 }
 0x6d5   : > { %v1718_v9 = vadd.f32 %v2687_v7, %v1533_v5  ;;  %v1677_v10 = vpop.f32.mrb[9].mxu1 }
 0x6d6   : > { %v1716_v12 = vadd.f32 %v1677_v10, %v1531_v6  ;;  %v2688_v13 = vpop.f32.mrb[10].mxu1 }
 0x6d7   : > { %1734 = vst [vmem:[#allocation2 + $0x50] sm:$0xff] %v1718_v9  ;;  %v1719_v14 = vadd.f32 %v2688_v13, %v1534_v8  ;;  %v1680_v15 = vpop.f32.mrb[11].mxu1 }
 0x6d8   : > { %1732 = vst [vmem:[#allocation2 + $0x40] sm:$0xff] %v1716_v12  ;;  %v1717_v16 = vadd.f32 %v1680_v15, %v1532_v11 }
 0x6d9   : > { %1735 = vst [vmem:[#allocation2 + $0x58] sm:$0xff] %v1719_v14 }
 0x6da   : > { %1733 = vst [vmem:[#allocation2 + $0x48] sm:$0xff] %v1717_v16 }
 0x6dc   : > { %v2691_v24 = vpop.f32.mrb[12].mxu1 }
 0x6dd   : > { %v1722_v26 = vadd.f32 %v2691_v24, %v1537_v17  ;;  %v1693_v27 = vpop.f32.mrb[13].mxu1 }
 0x6de   : > { %v1720_v29 = vadd.f32 %v1693_v27, %v1535_v23  ;;  %v2692_v30 = vpop.f32.mrb[14].mxu1 }
 0x6df   : > { %1738 = vst [vmem:[#allocation2 + $0x70] sm:$0xff] %v1722_v26  ;;  %v1723_v31 = vadd.f32 %v2692_v30, %v1538_v25  ;;  %v1696_v32 = vpop.f32.mrb[15].mxu1 }
 0x6e0   : > { %1736 = vst [vmem:[#allocation2 + $0x60] sm:$0xff] %v1720_v29  ;;  %v1721_v33 = vadd.f32 %v1696_v32, %v1536_v28 }
 0x6e1   : > { %1739 = vst [vmem:[#allocation2 + $0x78] sm:$0xff] %v1723_v31 }
 0x6e2   : > { %1737 = vst [vmem:[#allocation2 + $0x68] sm:$0xff] %v1721_v33 }
 0x6e3 PF: > { %v1743_v34 = vld [vmem:[#allocation2] sm:$0xff]  ;;  %v1744_v35 = vld [vmem:[#allocation2 + $0x8] sm:$0xff]  ;;  %v1745_v36 = vld [vmem:[#allocation2 + $0x10] sm:$0xff]  ;;  %p2348_p5 = scmp.ne.s32.totalorder %s3701_s28, 0 }
 0x6e4   : > { %v1746_v37 = vld [vmem:[#allocation2 + $0x18] sm:$0xff]  ;;  %v1747_v38 = vld [vmem:[#allocation2 + $0x20] sm:$0xff]  ;;  %v1748_v39 = vld [vmem:[#allocation2 + $0x28] sm:$0xff] }
 0x6e5   : > { %v1749_v40 = vld [vmem:[#allocation2 + $0x30] sm:$0xff]  ;;  %v1750_v41 = vld [vmem:[#allocation2 + $0x38] sm:$0xff]  ;;  %v1751_v42 = vld [vmem:[#allocation2 + $0x40] sm:$0xff] }
 0x6e6   : > { %v1752_v43 = vld [vmem:[#allocation2 + $0x48] sm:$0xff]  ;;  %v1753_v44 = vld [vmem:[#allocation2 + $0x50] sm:$0xff]  ;;  %v1754_v45 = vld [vmem:[#allocation2 + $0x58] sm:$0xff] }
 0x6e7   : > { %v1755_v46 = vld [vmem:[#allocation2 + $0x60] sm:$0xff]  ;;  %v1757_v49 = vld [vmem:[#allocation2 + $0x70] sm:$0xff] }
 0x6e8   : > { %v2347_v47 = vld [vmem:[%s492_s10] ss:$0 sm:$0xff]  ;;  %v1758_v50 = vld [vmem:[#allocation2 + $0x78] sm:$0xff] }
 0x6e9   : > { %v1756_v48 = vld [vmem:[#allocation2 + $0x68] sm:$0xff]  ;;  %v1766_v51 = vadd.f32 %v2347_v47, %v1743_v34  ;;  %v1767_v52 = vadd.f32 %v2347_v47, %v1744_v35  ;;  %v1768_v53 = vadd.f32 %v2347_v47, %v1745_v36  ;;  %v1769_v54 = vadd.f32 %v2347_v47, %v1746_v37 }
 0x6ea   : > { %v1770_v55 = vadd.f32 %v2347_v47, %v1747_v38  ;;  %v1771_v56 = vadd.f32 %v2347_v47, %v1748_v39  ;;  %v1772_v57 = vadd.f32 %v2347_v47, %v1749_v40  ;;  %v1773_v58 = vadd.f32 %v2347_v47, %v1750_v41 }
 0x6eb   : > { %v1774_v59 = vadd.f32 %v2347_v47, %v1751_v42  ;;  %v1775_v60 = vadd.f32 %v2347_v47, %v1752_v43  ;;  %v1776_v61 = vadd.f32 %v2347_v47, %v1753_v44  ;;  %v1777_v62 = vadd.f32 %v2347_v47, %v1754_v45 }
 0x6ec   : > { %v1778_v63 = vadd.f32 %v2347_v47, %v1755_v46  ;;  %v1779_v0 = vadd.f32 %v2347_v47, %v1756_v48  ;;  %v1780_v3 = vadd.f32 %v2347_v47, %v1757_v49  ;;  %v1781_v18 = vadd.f32 %v2347_v47, %v1758_v50  ;;  %1809 = sbr.rel (%p2348_p5) target bundleno = 1783 (0x6f7), region = 108 }
 0x6ed   : > { %v1782_v19 = vmax.f32 %v1766_v51, 0.0  ;;  %v1783_v20 = vmax.f32 %v1767_v52, 0.0  ;;  %v1784_v21 = vmax.f32 %v1768_v53, 0.0  ;;  %v1785_v22 = vmax.f32 %v1769_v54, 0.0 }
 0x6ee   : > { %v1786_v1 = vmax.f32 %v1770_v55, 0.0  ;;  %v1787_v2 = vmax.f32 %v1771_v56, 0.0  ;;  %v1788_v4 = vmax.f32 %v1772_v57, 0.0  ;;  %v1789_v5 = vmax.f32 %v1773_v58, 0.0 }
 0x6ef   : > { %v1790_v6 = vmax.f32 %v1774_v59, 0.0  ;;  %v1791_v7 = vmax.f32 %v1775_v60, 0.0  ;;  %v1792_v8 = vmax.f32 %v1776_v61, 0.0  ;;  %v1793_v9 = vmax.f32 %v1777_v62, 0.0 }
 0x6f0   : > { %v1794_v10 = vmax.f32 %v1778_v63, 0.0  ;;  %v1795_v11 = vmax.f32 %v1779_v0, 0.0  ;;  %v1796_v12 = vmax.f32 %v1780_v3, 0.0  ;;  %v1797_v13 = vmax.f32 %v1781_v18, 0.0 }
 0x6f1   : > { %v1798_v14 = vpack.c.bf16 %v1783_v20, %v1782_v19  ;;  %v1799_v15 = vpack.c.bf16 %v1785_v22, %v1784_v21  ;;  %v1800_v16 = vpack.c.bf16 %v1787_v2, %v1786_v1  ;;  %v1801_v17 = vpack.c.bf16 %v1789_v5, %v1788_v4 }
 0x6f2   : > { %v1802_v23 = vpack.c.bf16 %v1791_v7, %v1790_v6  ;;  %v1803_v24 = vpack.c.bf16 %v1793_v9, %v1792_v8  ;;  %v1804_v25 = vpack.c.bf16 %v1795_v11, %v1794_v10  ;;  %v1805_v26 = vpack.c.bf16 %v1797_v13, %v1796_v12 }
 0x6f3   : > { %1814 = vst [vmem:[#allocation4] sm:$0xff] %v1798_v14  ;;  %1815 = vst [vmem:[#allocation4 + $0x8] sm:$0xff] %v1799_v15 }
 0x6f4   : > { %1816 = vst [vmem:[#allocation4 + $0x10] sm:$0xff] %v1800_v16  ;;  %1817 = vst [vmem:[#allocation4 + $0x18] sm:$0xff] %v1801_v17 }
 0x6f5   : > { %1818 = vst [vmem:[#allocation4 + $0x20] sm:$0xff] %v1802_v23  ;;  %1819 = vst [vmem:[#allocation4 + $0x28] sm:$0xff] %v1803_v24 }
 0x6f6   : > { %1820 = vst [vmem:[#allocation4 + $0x30] sm:$0xff] %v1804_v25  ;;  %1821 = vst [vmem:[#allocation4 + $0x38] sm:$0xff] %v1805_v26 }
 0x6f7 PF: > { %p2349_p12 = scmp.ne.s32.totalorder %s3701_s28, 1 }
 0x6f8   : > { %1829 = vst [vmem:[#allocation5] sm:$0xff] (!%p2349_p12), %v1798_v14  ;;  %1830 = vst [vmem:[#allocation5 + $0x8] sm:$0xff] (!%p2349_p12), %v1799_v15 }
 0x6f9   : > { %1824 = sbr.rel (%p2349_p12) target bundleno = 1792 (0x700), region = 112  ;;  %1831 = vst [vmem:[#allocation5 + $0x10] sm:$0xff] (!%p2349_p12), %v1800_v16  ;;  %1832 = vst [vmem:[#allocation5 + $0x18] sm:$0xff] (!%p2349_p12), %v1801_v17 }
 0x6fa   : > { %1833 = vst [vmem:[#allocation5 + $0x20] sm:$0xff] (!%p2349_p12), %v1802_v23  ;;  %1834 = vst [vmem:[#allocation5 + $0x28] sm:$0xff] (!%p2349_p12), %v1803_v24 }
 0x6fb   : > { %1835 = vst [vmem:[#allocation5 + $0x30] sm:$0xff] (!%p2349_p12), %v1804_v25  ;;  %1836 = vst [vmem:[#allocation5 + $0x38] sm:$0xff] (!%p2349_p12), %v1805_v26 }
 0x700 PF: > { %p1837_p13 = scmp.eq.s32.totalorder %s3144_s16, 1  ;;  %p2350_p0 = scmp.ne.s32.totalorder %s3144_s16, 1 }
 0x701   : > { %v3163_v27 = vmov (!%p2350_p0), 0.0   ;;  %vm3164_vm0 = vmmov (!%p2350_p0), 0   ;;  %v1842_v28 = vld [vmem:[%s3654_s2] sm:$0xf] (!%p2350_p0) }
 0x702   : > { %1840 = sbr.rel (%p2350_p0) target bundleno = 2041 (0x7f9), region = 116  ;;  %2693 = vmatprep.subr.bf16.mxu0 (!%p2350_p0), %v3163_v27  ;;  %2709 = vmatprep.mubr.msk.bf16.mxu0 (!%p2350_p0), %vm3164_vm0, %v3163_v27  ;;  %v1841_v29 = vld [vmem:[#allocation3] sm:$0xff] (!%p2350_p0) }
 0x703   : > { %2694 = vmatpush3.bf16.msra.mxu0 (!%p2350_p0), %v1798_v14 }
 0x704   : > { %2695 = vmatprep.subr.bf16.mxu0 (!%p2350_p0), %v3163_v27 }
 0x707   : > { %2696 = vmatpush3.bf16.msra.mxu0 (!%p2350_p0), %v1799_v15 }
 0x708   : > { %2697 = vmatprep.subr.bf16.mxu0 (!%p2350_p0), %v3163_v27 }
 0x70b   : > { %2698 = vmatpush3.bf16.msra.mxu0 %v1800_v16 }
 0x70c   : > { %2699 = vmatprep.subr.bf16.mxu0 %v3163_v27 }
 0x70f   : > { %2700 = vmatpush3.bf16.msra.mxu0 %v1801_v17 }
 0x710   : > { %2701 = vmatprep.subr.bf16.mxu0 %v3163_v27 }
 0x713   : > { %2702 = vmatpush3.bf16.msra.mxu0 %v1802_v23 }
 0x714   : > { %2703 = vmatprep.subr.bf16.mxu0 %v3163_v27 }
 0x717   : > { %2704 = vmatpush3.bf16.msra.mxu0 %v1803_v24 }
 0x718   : > { %2705 = vmatprep.subr.bf16.mxu0 %v3163_v27 }
 0x71b   : > { %2706 = vmatpush3.bf16.msra.mxu0 %v1804_v25 }
 0x71c   : > { %2707 = vmatprep.subr.bf16.mxu0 %v3163_v27 }
 0x71f   : > { %2708 = vmatpush3.bf16.msra.mxu0 %v1805_v26 }
 0x722   : > { %2710 = vmatmul.mubr.bf16.vlgmr.msra.gmra.mrb[0].mxu0 %v1842_v28 }
 0x7f5   : > { %v1877_v30 = vpop.f32.mrb[0].mxu0 }
 0x7f6   : > { %v1883_v31 = vadd.f32 %v1877_v30, %v1841_v29  ;;  %v2711_v32 = vpop.f32.mrb[1].mxu0 }
 0x7f7   : > { %v1880_v33 = vpop.f32.mrb[2].mxu0 }
 0x7f8   : > { %1884 = vst [vmem:[#allocation3] sm:$0xff] %v1883_v31  ;;  %v2712_v34 = vpop.f32.mrb[3].mxu0 }
 0x7f9 PF: > { %1888 = sbr.rel (!%p1837_p13) target bundleno = 2613 (0xa35), region = 120  ;;  %s3686_s23 = sld [smem:[#allocation22_spill]] (%p1837_p13)  ;;  %v2898_v36 = vld [vmem:[#allocation12] sm:$0xff] (%p1837_p13)   ;;  %v3165_v37 = vmov (%p1837_p13), 0   ;;  %v3166_v38 = vmov (%p1837_p13), 0.0   ;;  %v2899_v39 = vld [vmem:[#allocation12 + $0x8] sm:$0xff] (%p1837_p13)  }
 0x7fa   : > { %2897 = vset.pattern.permute.xlu0 (%p1837_p13), %v3165_v37  ;;  %2713 = vmatprep.subr.bf16.mxu0 (%p1837_p13), %v3166_v38  ;;  %vm3167_vm1 = vmmov (%p1837_p13), 0   ;;  %v2900_v40 = vld [vmem:[#allocation12 + $0x10] sm:$0xff] (%p1837_p13)   ;;  %v2906_v41 = vld [vmem:[#allocation13] sm:$0xff] (%p1837_p13)   ;;  %v2901_v42 = vld [vmem:[#allocation12 + $0x18] sm:$0xff] (%p1837_p13)   ;;  %s3687_s20 = sld [smem:[#allocation23_spill]] (%p1837_p13)  ;;  %s3688_s25 = sld [smem:[#allocation24_spill]] (%p1837_p13) }
 0x7fb   : > { %2714 = vmatpush3.bf16.msra.mxu0 (%p1837_p13), %v2898_v36  ;;  %2733 = vmatprep.subr.bf16.mxu1 (%p1837_p13), %v3166_v38  ;;  %v2907_v43 = vld [vmem:[#allocation13 + $0x8] sm:$0xff] (%p1837_p13)   ;;  %v2902_v44 = vld [vmem:[#allocation12 + $0x20] sm:$0xff] (%p1837_p13)   ;;  %v2908_v45 = vld [vmem:[#allocation13 + $0x10] sm:$0xff] (%p1837_p13)  }
 0x7fc   : > { %2715 = vmatprep.subr.bf16.mxu0 (%p1837_p13), %v3166_v38  ;;  %2729 = vmatprep.mubr.msk.bf16.mxu0 (%p1837_p13), %vm3167_vm1, %v3166_v38  ;;  %v2903_v46 = vld [vmem:[#allocation12 + $0x28] sm:$0xff] (%p1837_p13)   ;;  %v2909_v47 = vld [vmem:[#allocation13 + $0x18] sm:$0xff] (%p1837_p13)   ;;  %v2904_v48 = vld [vmem:[#allocation12 + $0x30] sm:$0xff] (%p1837_p13)  }
 0x7fd   : > { %2749 = vmatprep.mubr.msk.bf16.mxu1 (%p1837_p13), %vm3167_vm1, %v3166_v38  ;;  %2734 = vmatpush3.bf16.msra.mxu1 (%p1837_p13), %v2906_v41  ;;  %v2910_v49 = vld [vmem:[#allocation13 + $0x20] sm:$0xff] (%p1837_p13)   ;;  %v2905_v50 = vld [vmem:[#allocation12 + $0x38] sm:$0xff] (%p1837_p13)   ;;  %v2911_v51 = vld [vmem:[#allocation13 + $0x28] sm:$0xff] (%p1837_p13)  }
 0x7fe   : > { %2735 = vmatprep.subr.bf16.mxu1 (%p1837_p13), %v3166_v38  ;;  %v2912_v56 = vld [vmem:[#allocation13 + $0x30] sm:$0xff] (%p1837_p13)   ;;  %v2913_v57 = vld [vmem:[#allocation13 + $0x38] sm:$0xff] (%p1837_p13)  }
 0x7ff   : > { %v1890_v35 = vld [vmem:[%s3686_s23] sm:$0xff] (%p1837_p13)  ;;  %2716 = vmatpush3.bf16.msra.mxu0 (%p1837_p13), %v2899_v39 }
 0x800   : > { %1893 = vperm.xlu0 %2897, %v1890_v35   ;;  %2717 = vmatprep.subr.bf16.mxu0 %v3166_v38  ;;  %v1889_v52 = vld [vmem:[#allocation3] sm:$0xff] }
 0x801   : > { %2736 = vmatpush3.bf16.msra.mxu1 %v2907_v43  ;;  %v2352_v58 = vld [vmem:[%s3687_s20] ss:$0 sm:$0xff] }
 0x802   : > { %2737 = vmatprep.subr.bf16.mxu1 %v3166_v38  ;;  %v2361_v18 = vld [vmem:[%s3688_s25] ss:$0 sm:$0xff] }
 0x803   : > { %2718 = vmatpush3.bf16.msra.mxu0 %v2900_v40 }
 0x804   : > { %2719 = vmatprep.subr.bf16.mxu0 %v3166_v38 }
 0x805   : > { %2738 = vmatpush3.bf16.msra.mxu1 %v2908_v45 }
 0x806   : > { %2739 = vmatprep.subr.bf16.mxu1 %v3166_v38 }
 0x807   : > { %2720 = vmatpush3.bf16.msra.mxu0 %v2901_v42 }
 0x808   : > { %2721 = vmatprep.subr.bf16.mxu0 %v3166_v38 }
 0x809   : > { %2740 = vmatpush3.bf16.msra.mxu1 %v2909_v47 }
 0x80a   : > { %2741 = vmatprep.subr.bf16.mxu1 %v3166_v38 }
 0x80b   : > { %2722 = vmatpush3.bf16.msra.mxu0 %v2902_v44 }
 0x80c   : > { %2723 = vmatprep.subr.bf16.mxu0 %v3166_v38 }
 0x80d   : > { %2742 = vmatpush3.bf16.msra.mxu1 %v2910_v49 }
 0x80e   : > { %2743 = vmatprep.subr.bf16.mxu1 %v3166_v38 }
 0x80f   : > { %2724 = vmatpush3.bf16.msra.mxu0 %v2903_v46 }
 0x810   : > { %2725 = vmatprep.subr.bf16.mxu0 %v3166_v38 }
 0x811   : > { %2744 = vmatpush3.bf16.msra.mxu1 %v2911_v51 }
 0x812   : > { %2745 = vmatprep.subr.bf16.mxu1 %v3166_v38 }
 0x813   : > { %2726 = vmatpush3.bf16.msra.mxu0 %v2904_v48 }
 0x814   : > { %2727 = vmatprep.subr.bf16.mxu0 %v3166_v38 }
 0x815   : > { %2746 = vmatpush3.bf16.msra.mxu1 %v2912_v56 }
 0x816   : > { %2747 = vmatprep.subr.bf16.mxu1 %v3166_v38 }
 0x817   : > { %2728 = vmatpush3.bf16.msra.mxu0 %v2905_v50 }
 0x819   : > { %2748 = vmatpush3.bf16.msra.mxu1 %v2913_v57 }
 0x87f   : > { %v1894_v53 = vpop.permute.xlu0 %1893 }
 0x880   : > { %v1896_v54 = vmul.f32 %v1894_v53, %v1889_v52 }
 0x882   : > { %v1897_v55 = vpack.c.bf16 %v1896_v54, %v1896_v54 }
 0x884   : > { %2730 = vmatmul.mubr.bf16.vlgmr.msra.gmra.mrb[0].mxu0 %v1897_v55 }
 0x957   : > { %v2003_v59 = vpop.f32.mrb[0].mxu0 }
 0x958   : > { %v2004_v60 = vadd.f32 %v2352_v58, %v2003_v59  ;;  %v2731_v61 = vpop.f32.mrb[1].mxu0 }
 0x959   : > { %v2006_v62 = vpop.f32.mrb[2].mxu0 }
 0x95a   : > { %v2009_v63 = vmax.f32 %v2004_v60, 0.0  ;;  %v2732_v0 = vpop.f32.mrb[3].mxu0 }
 0x95c   : > { %v2010_v3 = vpack.c.bf16 %v2009_v63, %v2009_v63 }
 0x95e   : > { %2750 = vmatmul.mubr.bf16.vlgmr.msra.gmra.mrb[0].mxu1 %v2010_v3 }
 0xa31   : > { %v2116_v19 = vpop.f32.mrb[0].mxu1 }
 0xa32   : > { %v2117_v20 = vadd.f32 %v2361_v18, %v2116_v19  ;;  %v2751_v21 = vpop.f32.mrb[1].mxu1 }
 0xa33   : > { %v2119_v22 = vpop.f32.mrb[2].mxu1 }
 0xa34   : > { %2122 = vst [vmem:[#allocation15] sm:$0xff] %v2117_v20  ;;  %v2752_v1 = vpop.f32.mrb[3].mxu1 }
 0xa35 PF: > { %p2801_p2 = scmp.eq.s32.totalorder %s3253_s19, 1  ;;  %s3168_s9 = smov [#allocation15]  }
 0xa36   : > { %s2130_s29 = sshll.u32 %s3168_s9, 4  ;;  %s2131_s29 = int_to_ptr.vmem [resolvable:$true] %s2130_s29 }
 0xa37   : > { %s3056_s7 = scalar_lea.vmem %s2131_s29, 128  ;;  %p3063_p3 = scmp.lt.s32.totalorder %s2131_s29, %s2131_s29 }
 0xa38   : > { %p3057_p6 = scmp.ne.s32.totalorder %s2131_s29, %s3056_s7  ;;  %p3064_p8 = scmp.lt.s32.totalorder %s3056_s7, %s3056_s7 }
 0xa3a   : > { %p3058_p10 = pnand %p3057_p6, %p2801_p2  ;;  %p3065_p11 = por %p3064_p8, %p3063_p3 }
 0xa3c   : > { %p3059_p1 = pneg %p3058_p10 }
 0xa3e   : > { %p3066_p9 = pnand %p3065_p11, %p3059_p1 }
 0xa40   : > { %3069 = shalt.err (!%p3066_p9)
}
 0xa41   : > { %s3689_s13 = sld [smem:[#allocation25_spill]] }
 0xa47   : > { %s3690_s3 = smov %s3689_s13  ;;  %s3070_s30 = scalar_lea.hbm %s3689_s13, 128 }
 0xa48   : > { %p3071_p4 = scmp.ne.s32.totalorder %s3690_s3, %s3070_s30  ;;  %p3076_p12 = scmp.lt.u32.totalorder %s3070_s30, %s3690_s3 }
 0xa4a   : > { %p3072_p7 = pnand %p3071_p4, %p2801_p2 }
 0xa4c   : > { %p3073_p5 = pneg %p3072_p7 }
 0xa4e   : > { %p3078_p13 = pnand %p3076_p12, %p3073_p5 }
 0xa50   : > { %3081 = shalt.err (!%p3078_p13)
}
 0xa51   : > { %2772 = dma.vmem_to_hbm [thread:$0]  (%p2801_p2), %s2131_s29, 128, %s3690_s3, [#allocation8]  }
 0xa52   : > { %3127 = dma.done.wait (%p2801_p2), [#allocation8], 128  }
 0xa53   : > { %3129 = vsyncadd (%p2801_p2), [#allocation8], 4294967168 }
 0xa54 PF: > { %s24_s18 = sadd.s32 1, %s3152_s18   ;;  %s3691_s13 = smov %s3136_s14 }
 0xa55   : > { %p21_p0 = scmp.ge.s32.totalorder %s24_s18, 4   ;;  %s3692_s14 = smov %s3140_s15 }
 0xa56   : > { %s3693_s15 = smov %s3398_s27  ;;  %s3694_s16 = smov %s3148_s17 }
 0xa57   : > { %s3695_s17 = smov %s3697_s22  ;;  %23 = sbr.rel (!%p21_p0) target bundleno = 11 (0xb), region = 164 }
 0xa5e   :  { %2143 = vsyncpa [#allocation7], 1 }
 0xa5f   :  { %2145 = vsyncpa [#allocation7 + $0x1], 1 }
 0xa60   :  { %2146 = vsyncpa [#allocation10], 1 }
 0xa61   :  { %2147 = vsyncpa [#allocation14], 1 }
 0xa62   :  { %2148 = vsyncpa [#allocation8], 1 }
 0xa63   :  { %2150 = vsyncpa [#allocation8 + $0x1], 1 }

</bundles_post_ra>
